<compile_context>
chip_gen: v5e
topology: v5e:2x2
jax: 0.10.0
libtpu: 0.0.40
codegen_flags: <defaults>
</compile_context>

<pallas_src>
import functools

import jax
import jax.numpy as jnp
import numpy as np
from jax import lax
from jax.experimental import pallas as pl
from jax.experimental.pallas import tpu as pltpu

MATMUL_DTYPE = jnp.bfloat16   # bf16 MXU on v5e/v6e/v7x; state & gate math stay f32


def _round_up(x, m):
    return ((x + m - 1) // m) * m


def _vmem_capacity_bytes():
    try:
        return int(pltpu.get_tpu_info().vmem_capacity_bytes)
    except Exception:
        return 64 * 1024 * 1024   # conservative (v7x per-TC VMEM)


# ----------------------------------------------------------------------------
# Fused kernel: per chunk -> one input-projection GEMM + TC recurrence steps.
# ----------------------------------------------------------------------------
def _encoder_gru_kernel(x_ref, wih_ref, whh_ref, bih_ref, bhn_ref, out_ref, h_ref,
                        *, batch_pad, hidden_pad, time_chunk):
    Bp, Hp, TC = batch_pad, hidden_pad, time_chunk

    @pl.when(pl.program_id(0) == 0)
    def _():
        # PyTorch nn.GRU default initial hidden state is zeros.
        h_ref[...] = jnp.zeros_like(h_ref)

    # Chunk-wide input projection (off the per-timestep serial path).
    # bih_ref already holds b_ih with b_hr / b_hz folded in.
    gi = jnp.dot(x_ref[...], wih_ref[...],
                 preferred_element_type=jnp.float32) + bih_ref[...]     # (TC*Bp, 3Hp) f32

    whh = whh_ref[...]                                   # (Hp, 3Hp) resident, bf16
    bhn = jnp.broadcast_to(bhn_ref[...], (Bp, Hp))       # hoisted broadcast (once/chunk)

    h = h_ref[...]                                       # (Bp, Hp) f32, carried in vregs
    for tau in range(TC):                                # static unroll, aligned offsets
        row = tau * Bp                                   # multiple of 8 (Bp % 8 == 0)
        gi_t = gi[row:row + Bp, :]                       # sublane-aligned free view
        gh = jnp.dot(h.astype(whh.dtype), whh,
                     preferred_element_type=jnp.float32)                # (Bp, 3Hp) f32
        # Gate columns are Hp-aligned -> lane-tile aligned slices (free views).
        r = jax.nn.sigmoid(gi_t[:, 0:Hp] + gh[:, 0:Hp])
        z = jax.nn.sigmoid(gi_t[:, Hp:2 * Hp] + gh[:, Hp:2 * Hp])
        n = jnp.tanh(gi_t[:, 2 * Hp:3 * Hp] + r * (gh[:, 2 * Hp:3 * Hp] + bhn))
        h = z * (h - n) + n                              # == (1-z)*n + z*h
        out_ref[row:row + Bp, :] = h                     # lane-dense store (Hp % 128 == 0)
    h_ref[...] = h                                       # carry to the next time chunk


def _pick_time_chunk(T, Bp, E, Hp, vmem_cap, resident_bytes):
    """Largest static-unroll chunk whose pipeline buffers fit the VMEM budget."""
    budget = max(2 << 20, int(0.5 * vmem_cap) - 2 * resident_bytes)
    x_it = jnp.dtype(MATMUL_DTYPE).itemsize

    def chunk_bytes(tc):
        return (2 * tc * Bp * E * x_it          # double-buffered x chunk
                + 2 * tc * Bp * Hp * 4          # double-buffered output chunk
                + tc * Bp * 3 * Hp * 4)         # gi working set

    max_tc = 32 if Hp <= 256 else (16 if Hp <= 512 else 8)   # bound vreg live ranges
    candidates = [tc for tc in (32, 16, 8, 4, 2, 1) if tc <= max(T, 1) and tc <= max_tc] or [1]
    for tc in candidates:                        # prefer exact divisors (no padded steps)
        if T % tc == 0 and chunk_bytes(tc) <= budget:
            return tc
    for tc in candidates:
        if chunk_bytes(tc) <= budget:
            return tc
    return 1


def encoder_gru_pallas(x_tm, wih_p, whh_p, bih_f, bhn_p, *,
                       batch_pad, time_pad, hidden_pad, time_chunk, vmem_limit):
    Bp, Tp, Hp, TC = batch_pad, time_pad, hidden_pad, time_chunk
    E = x_tm.shape[-1]
    kernel = functools.partial(_encoder_gru_kernel,
                               batch_pad=Bp, hidden_pad=Hp, time_chunk=TC)
    return pl.pallas_call(
        kernel,
        out_shape=jax.ShapeDtypeStruct((Tp * Bp, Hp), jnp.float32),
        grid_spec=pltpu.PrefetchScalarGridSpec(
            num_scalar_prefetch=0,
            grid=(Tp // TC,),
            in_specs=[
                pl.BlockSpec((TC * Bp, E), lambda c: (c, 0)),     # x chunk (time-major)
                pl.BlockSpec((E, 3 * Hp), lambda c: (0, 0)),      # W_ih^T  (resident)
                pl.BlockSpec((Hp, 3 * Hp), lambda c: (0, 0)),     # W_hh^T  (resident)
                pl.BlockSpec((1, 3 * Hp), lambda c: (0, 0)),      # fused input bias
                pl.BlockSpec((1, Hp), lambda c: (0, 0)),          # b_hn
            ],
            out_specs=pl.BlockSpec((TC * Bp, Hp), lambda c: (c, 0)),
            scratch_shapes=[pltpu.VMEM((Bp, Hp), jnp.float32)],   # hidden state
        ),
        compiler_params=pltpu.CompilerParams(
            dimension_semantics=("arbitrary",),                   # time is serial
            vmem_limit_bytes=vmem_limit,
        ),
    )(x_tm, wih_p, whh_p, bih_f, bhn_p)


# ----------------------------------------------------------------------------
# Parameter preparation (ONCE, outside jit): transpose + gate-pad + cast weights.
# ----------------------------------------------------------------------------
def prepare_encoder_params(raw, matmul_dtype=MATMUL_DTYPE):
    w_ih = np.asarray(raw["w_ih"], np.float32)   # (3H, E)
    w_hh = np.asarray(raw["w_hh"], np.float32)   # (3H, H)
    b_ih = np.asarray(raw["b_ih"], np.float32)   # (3H,)
    b_hh = np.asarray(raw["b_hh"], np.float32)   # (3H,)
    H = w_hh.shape[1]
    E = w_ih.shape[1]
    Hp = _round_up(H, 128)                       # lane-aligned gate width

    # Padding invariant: all padded rows/columns are EXACTLY zero, so padded h
    # columns stay 0 forever (h0 = 0) and never leak into real gate columns.
    wih_p = np.zeros((E, 3 * Hp), np.float32)
    whh_p = np.zeros((Hp, 3 * Hp), np.float32)
    bih_f = np.zeros((1, 3 * Hp), np.float32)
    bhn_p = np.zeros((1, Hp), np.float32)
    for g in range(3):                           # gate order (r, z, n) as PyTorch
        wih_p[:, g * Hp:g * Hp + H] = w_ih[g * H:(g + 1) * H, :].T
        whh_p[:H, g * Hp:g * Hp + H] = w_hh[g * H:(g + 1) * H, :].T
        bih_f[0, g * Hp:g * Hp + H] = b_ih[g * H:(g + 1) * H]
    # Fold b_hr / b_hz into the hoisted GEMM bias; only b_hn stays per-step.
    bih_f[0, 0:H] += b_hh[0:H]
    bih_f[0, Hp:Hp + H] += b_hh[H:2 * H]
    bhn_p[0, 0:H] = b_hh[2 * H:3 * H]

    return {
        "embedding": jnp.asarray(raw["embedding"], matmul_dtype),  # bf16 table
        "wih_p": jnp.asarray(wih_p, matmul_dtype),
        "whh_p": jnp.asarray(whh_p, matmul_dtype),
        "bih_f": jnp.asarray(bih_f, jnp.float32),
        "bhn_p": jnp.asarray(bhn_p, jnp.float32),
        "hidden_size": H,
        "embed_size": E,
        "hidden_pad": Hp,
    }


# ----------------------------------------------------------------------------
# Encoder forward (embedding gather is glue; all GRU math runs in the kernel).
# ----------------------------------------------------------------------------
def encoder_forward(source, params):
    """source: (B, T) int32 token ids -> encodings (B, T, H) float32."""
    B, T = source.shape
    H = params["hidden_size"]
    Hp = params["hidden_pad"]
    E = params["embed_size"]
    Bp = _round_up(max(B, 1), 8)                 # full-sublane batch tile

    x_it = jnp.dtype(MATMUL_DTYPE).itemsize
    resident = (E * 3 * Hp + Hp * 3 * Hp) * x_it + (3 * Hp + Hp) * 4
    vmem_cap = _vmem_capacity_bytes()
    TC = _pick_time_chunk(T, Bp, E, Hp, vmem_cap, resident)
    Tp = _round_up(T, TC)
    chunk = (2 * TC * Bp * E * x_it + 2 * TC * Bp * Hp * 4
             + TC * Bp * 3 * Hp * 4 + Bp * Hp * 4)
    vmem_limit = int(min(vmem_cap, max(2 * resident + chunk + (8 << 20), 32 << 20)))

    # Pad batch to Bp and time to a chunk multiple with token id 0; padded rows /
    # trailing timesteps are computed and discarded (no coupling into real rows).
    src_p = jnp.zeros((Bp, Tp), source.dtype).at[:B, :T].set(source)
    # Gather directly time-major (no (B,T,E) HBM transpose); table is bf16.
    x_tm = params["embedding"][src_p.T].reshape(Tp * Bp, E)
    # Dropout: eval-mode identity (see TODO at top).

    out_flat = encoder_gru_pallas(
        x_tm, params["wih_p"], params["whh_p"], params["bih_f"], params["bhn_p"],
        batch_pad=Bp, time_pad=Tp, hidden_pad=Hp, time_chunk=TC,
        vmem_limit=vmem_limit)

    # Trim padding and return PyTorch batch_first layout (single output transpose).
    out = out_flat.reshape(Tp, Bp, Hp)[:T, :B, :H]
    return jnp.transpose(out, (1, 0, 2))


# ----------------------------------------------------------------------------
# Pure-JAX reference GRU (for silent correctness checks).
# ----------------------------------------------------------------------------
def _gru_reference(embed_btE, w_ih, w_hh, b_ih, b_hh, *, matmul_dtype=jnp.float32):
    B, T, E = embed_btE.shape
    H = w_hh.shape[1]
    wih = w_ih.astype(matmul_dtype)
    whh = w_hh.astype(matmul_dtype)

    def step(h, x_t):
        gi = jnp.dot(x_t.astype(matmul_dtype), wih.T,
                     preferred_element_type=jnp.float32) + b_ih
        gh = jnp.dot(h.astype(matmul_dtype), whh.T,
                     preferred_element_type=jnp.float32) + b_hh
        i_r, i_z, i_n = jnp.split(gi, 3, axis=-1)
        h_r, h_z, h_n = jnp.split(gh, 3, axis=-1)
        r = jax.nn.sigmoid(i_r + h_r)
        z = jax.nn.sigmoid(i_z + h_z)
        n = jnp.tanh(i_n + r * h_n)
        h_new = (1.0 - z) * n + z * h
        return h_new, h_new

    h0 = jnp.zeros((B, H), jnp.float32)
    xs = jnp.transpose(embed_btE, (1, 0, 2)).astype(jnp.float32)
    _, outs = lax.scan(step, h0, xs)
    return jnp.transpose(outs, (1, 0, 2))


# ----------------------------------------------------------------------------
# Deterministic parameter construction (shapes per nn.Embedding / nn.GRU).
# ----------------------------------------------------------------------------
def init_raw_params(key, hidden_size, embed_size, vocab_size):
    k_emb, k_wih, k_whh, k_bih, k_bhh = jax.random.split(key, 5)
    bound = 1.0 / np.sqrt(hidden_size)
    return {
        "embedding": jax.random.normal(k_emb, (vocab_size, embed_size), jnp.float32),
        "w_ih": jax.random.uniform(k_wih, (3 * hidden_size, embed_size),
                                   jnp.float32, -bound, bound),
        "w_hh": jax.random.uniform(k_whh, (3 * hidden_size, hidden_size),
                                   jnp.float32, -bound, bound),
        "b_ih": jax.random.uniform(k_bih, (3 * hidden_size,), jnp.float32, -bound, bound),
        "b_hh": jax.random.uniform(k_bhh, (3 * hidden_size,), jnp.float32, -bound, bound),
    }


if __name__ == "__main__":
    hidden_size = 32
    embed_size = 32
    vocab_size = 50
    batch = 2
    seq_len = 8

    key = jax.random.PRNGKey(0)
    k_params, k_src = jax.random.split(key)
    raw = init_raw_params(k_params, hidden_size, embed_size, vocab_size)
    params = prepare_encoder_params(raw)      # one-time transpose / pad / bf16 cast
    source = jax.random.randint(k_src, (batch, seq_len), 0, vocab_size, jnp.int32)

    fwd = jax.jit(lambda s: encoder_forward(s, params))
    encodings = jax.block_until_ready(fwd(source))
    assert encodings.shape == (batch, seq_len, hidden_size)

    # (a) Tight check vs a reference that mimics the kernel's bf16-MXU numerics.
    emb_q = raw["embedding"].astype(MATMUL_DTYPE)[source]
    ref_q = _gru_reference(emb_q, raw["w_ih"], raw["w_hh"], raw["b_ih"], raw["b_hh"],
                           matmul_dtype=MATMUL_DTYPE)
    np.testing.assert_allclose(np.asarray(encodings), np.asarray(ref_q),
                               rtol=2e-3, atol=2e-3)
    # (b) Loose check vs the full-f32 PyTorch-semantics reference (bf16 matmul path).
    emb_f = raw["embedding"][source].astype(jnp.float32)
    ref_f = _gru_reference(emb_f, raw["w_ih"], raw["w_hh"], raw["b_ih"], raw["b_hh"],
                           matmul_dtype=jnp.float32)
    np.testing.assert_allclose(np.asarray(encodings), np.asarray(ref_f),
                               rtol=5e-2, atol=5e-2)

    print("KERNEL_OK")
</pallas_src>

<mosaic_0001>
module attributes {stable_mosaic.version = 11 : i64} {
  func.func @_encoder_gru_kernel(%arg0: i32, %arg1: memref<64x32xbf16, #tpu.memory_space<vmem>>, %arg2: memref<32x384xbf16, #tpu.memory_space<vmem>>, %arg3: memref<128x384xbf16, #tpu.memory_space<vmem>>, %arg4: memref<1x384xf32, #tpu.memory_space<vmem>>, %arg5: memref<1x128xf32, #tpu.memory_space<vmem>>, %arg6: memref<64x128xf32, #tpu.memory_space<vmem>>, %arg7: memref<8x128xf32, #tpu.memory_space<vmem>>) attributes {dimension_semantics = [#tpu.dimension_semantics<arbitrary>], iteration_bounds = array<i64: 1>, scalar_prefetch = 0 : i64, scratch_operands = 1 : i64, tpu.core_type = #tpu.core_type<tc>, window_params = [{transform_indices = @transform_0, window_bounds = array<i64: 64, 32>}, {pipeline_mode = #tpu.pipeline_mode<synchronous>, transform_indices = @transform_1, window_bounds = array<i64: 32, 384>}, {pipeline_mode = #tpu.pipeline_mode<synchronous>, transform_indices = @transform_2, window_bounds = array<i64: 128, 384>}, {pipeline_mode = #tpu.pipeline_mode<synchronous>, transform_indices = @transform_3, window_bounds = array<i64: 1, 384>}, {pipeline_mode = #tpu.pipeline_mode<synchronous>, transform_indices = @transform_4, window_bounds = array<i64: 1, 128>}, {transform_indices = @transform_5, window_bounds = array<i64: 64, 128>}]} {
    %c0_i32 = arith.constant 0 : i32
    %0 = arith.cmpi eq, %arg0, %c0_i32 : i32
    %1 = arith.extui %0 : i1 to i32
    %c0_i32_0 = arith.constant 0 : i32
    %2 = arith.cmpi ne, %1, %c0_i32_0 : i32
    scf.if %2 {
      %cst_47 = arith.constant 0.000000e+00 : f32
      %247 = vector.broadcast %cst_47 : f32 to vector<8x128xf32>
      %c0_48 = arith.constant 0 : index
      %c0_49 = arith.constant 0 : index
      %248 = vector.load %arg7[%c0_48, %c0_49] : memref<8x128xf32, #tpu.memory_space<vmem>>, vector<8x128xf32>
      tpu.vector_store %arg7[%c0_48, %c0_49], %247 {strides = array<i32>} : memref<8x128xf32, #tpu.memory_space<vmem>>, vector<8x128xf32>,
    } else {
    }
    %c0 = arith.constant 0 : index
    %c0_1 = arith.constant 0 : index
    %3 = vector.load %arg1[%c0, %c0_1] : memref<64x32xbf16, #tpu.memory_space<vmem>>, vector<64x32xbf16>
    %c0_2 = arith.constant 0 : index
    %c0_3 = arith.constant 0 : index
    %4 = vector.load %arg2[%c0_2, %c0_3] : memref<32x384xbf16, #tpu.memory_space<vmem>>, vector<32x384xbf16>
    %cst = arith.constant dense<0.000000e+00> : vector<64x384xf32>
    %5 = tpu.matmul %3, %4, %cst {dimension_numbers = #tpu.dot_dimension_numbers<[1], [0], [0], [1], [0, 0, 1, 1], [], []>} : vector<64x32xbf16>, vector<32x384xbf16>, vector<64x384xf32> -> vector<64x384xf32>
    %c0_4 = arith.constant 0 : index
    %c0_5 = arith.constant 0 : index
    %6 = vector.load %arg4[%c0_4, %c0_5] : memref<1x384xf32, #tpu.memory_space<vmem>>, vector<1x384xf32>
    %7 = vector.broadcast %6 : vector<1x384xf32> to vector<64x384xf32>
    %8 = arith.addf %5, %7 : vector<64x384xf32>
    %c0_6 = arith.constant 0 : index
    %c0_7 = arith.constant 0 : index
    %9 = vector.load %arg3[%c0_6, %c0_7] : memref<128x384xbf16, #tpu.memory_space<vmem>>, vector<128x384xbf16>
    %c0_8 = arith.constant 0 : index
    %c0_9 = arith.constant 0 : index
    %10 = vector.load %arg5[%c0_8, %c0_9] : memref<1x128xf32, #tpu.memory_space<vmem>>, vector<1x128xf32>
    %11 = vector.shape_cast %10 : vector<1x128xf32> to vector<1x128xf32>
    %12 = vector.broadcast %11 : vector<1x128xf32> to vector<8x128xf32>
    %c0_10 = arith.constant 0 : index
    %c0_11 = arith.constant 0 : index
    %13 = vector.load %arg7[%c0_10, %c0_11] : memref<8x128xf32, #tpu.memory_space<vmem>>, vector<8x128xf32>
    %14 = vector.extract_strided_slice %8 {offsets = [0, 0], sizes = [8, 384], strides = [1, 1]} : vector<64x384xf32> to vector<8x384xf32>
    %15 = arith.truncf %13 : vector<8x128xf32> to vector<8x128xbf16>
    %cst_12 = arith.constant dense<0.000000e+00> : vector<8x384xf32>
    %16 = tpu.matmul %15, %9, %cst_12 {dimension_numbers = #tpu.dot_dimension_numbers<[1], [0], [0], [1], [0, 0, 1, 1], [], []>} : vector<8x128xbf16>, vector<128x384xbf16>, vector<8x384xf32> -> vector<8x384xf32>
    %17 = vector.extract_strided_slice %14 {offsets = [0, 0], sizes = [8, 128], strides = [1, 1]} : vector<8x384xf32> to vector<8x128xf32>
    %18 = vector.extract_strided_slice %16 {offsets = [0, 0], sizes = [8, 128], strides = [1, 1]} : vector<8x384xf32> to vector<8x128xf32>
    %19 = arith.addf %17, %18 : vector<8x128xf32>
    %20 = arith.negf %19 : vector<8x128xf32>
    %21 = math.exp %20 : vector<8x128xf32>
    %cst_13 = arith.constant 1.000000e+00 : f32
    %22 = vector.broadcast %cst_13 : f32 to vector<8x128xf32>
    %23 = arith.addf %22, %21 : vector<8x128xf32>
    %24 = arith.divf %22, %23 : vector<8x128xf32>
    %25 = vector.extract_strided_slice %14 {offsets = [0, 128], sizes = [8, 128], strides = [1, 1]} : vector<8x384xf32> to vector<8x128xf32>
    %26 = vector.extract_strided_slice %16 {offsets = [0, 128], sizes = [8, 128], strides = [1, 1]} : vector<8x384xf32> to vector<8x128xf32>
    %27 = arith.addf %25, %26 : vector<8x128xf32>
    %28 = arith.negf %27 : vector<8x128xf32>
    %29 = math.exp %28 : vector<8x128xf32>
    %cst_14 = arith.constant 1.000000e+00 : f32
    %30 = vector.broadcast %cst_14 : f32 to vector<8x128xf32>
    %31 = arith.addf %30, %29 : vector<8x128xf32>
    %32 = arith.divf %30, %31 : vector<8x128xf32>
    %33 = vector.extract_strided_slice %14 {offsets = [0, 256], sizes = [8, 128], strides = [1, 1]} : vector<8x384xf32> to vector<8x128xf32>
    %34 = vector.extract_strided_slice %16 {offsets = [0, 256], sizes = [8, 128], strides = [1, 1]} : vector<8x384xf32> to vector<8x128xf32>
    %35 = arith.addf %34, %12 : vector<8x128xf32>
    %36 = arith.mulf %24, %35 : vector<8x128xf32>
    %37 = arith.addf %33, %36 : vector<8x128xf32>
    %38 = math.tanh %37 : vector<8x128xf32>
    %39 = arith.subf %13, %38 : vector<8x128xf32>
    %40 = arith.mulf %32, %39 : vector<8x128xf32>
    %41 = arith.addf %40, %38 : vector<8x128xf32>
    %c0_15 = arith.constant 0 : index
    %c0_16 = arith.constant 0 : index
    %42 = vector.load %arg6[%c0_15, %c0_16] : memref<64x128xf32, #tpu.memory_space<vmem>>, vector<8x128xf32>
    tpu.vector_store %arg6[%c0_15, %c0_16], %41 {strides = array<i32>} : memref<64x128xf32, #tpu.memory_space<vmem>>, vector<8x128xf32>,
    %43 = vector.extract_strided_slice %8 {offsets = [8, 0], sizes = [8, 384], strides = [1, 1]} : vector<64x384xf32> to vector<8x384xf32>
    %44 = arith.truncf %41 : vector<8x128xf32> to vector<8x128xbf16>
    %cst_17 = arith.constant dense<0.000000e+00> : vector<8x384xf32>
    %45 = tpu.matmul %44, %9, %cst_17 {dimension_numbers = #tpu.dot_dimension_numbers<[1], [0], [0], [1], [0, 0, 1, 1], [], []>} : vector<8x128xbf16>, vector<128x384xbf16>, vector<8x384xf32> -> vector<8x384xf32>
    %46 = vector.extract_strided_slice %43 {offsets = [0, 0], sizes = [8, 128], strides = [1, 1]} : vector<8x384xf32> to vector<8x128xf32>
    %47 = vector.extract_strided_slice %45 {offsets = [0, 0], sizes = [8, 128], strides = [1, 1]} : vector<8x384xf32> to vector<8x128xf32>
    %48 = arith.addf %46, %47 : vector<8x128xf32>
    %49 = arith.negf %48 : vector<8x128xf32>
    %50 = math.exp %49 : vector<8x128xf32>
    %cst_18 = arith.constant 1.000000e+00 : f32
    %51 = vector.broadcast %cst_18 : f32 to vector<8x128xf32>
    %52 = arith.addf %51, %50 : vector<8x128xf32>
    %53 = arith.divf %51, %52 : vector<8x128xf32>
    %54 = vector.extract_strided_slice %43 {offsets = [0, 128], sizes = [8, 128], strides = [1, 1]} : vector<8x384xf32> to vector<8x128xf32>
    %55 = vector.extract_strided_slice %45 {offsets = [0, 128], sizes = [8, 128], strides = [1, 1]} : vector<8x384xf32> to vector<8x128xf32>
    %56 = arith.addf %54, %55 : vector<8x128xf32>
    %57 = arith.negf %56 : vector<8x128xf32>
    %58 = math.exp %57 : vector<8x128xf32>
    %cst_19 = arith.constant 1.000000e+00 : f32
    %59 = vector.broadcast %cst_19 : f32 to vector<8x128xf32>
    %60 = arith.addf %59, %58 : vector<8x128xf32>
    %61 = arith.divf %59, %60 : vector<8x128xf32>
    %62 = vector.extract_strided_slice %43 {offsets = [0, 256], sizes = [8, 128], strides = [1, 1]} : vector<8x384xf32> to vector<8x128xf32>
    %63 = vector.extract_strided_slice %45 {offsets = [0, 256], sizes = [8, 128], strides = [1, 1]} : vector<8x384xf32> to vector<8x128xf32>
    %64 = arith.addf %63, %12 : vector<8x128xf32>
    %65 = arith.mulf %53, %64 : vector<8x128xf32>
    %66 = arith.addf %62, %65 : vector<8x128xf32>
    %67 = math.tanh %66 : vector<8x128xf32>
    %68 = arith.subf %41, %67 : vector<8x128xf32>
    %69 = arith.mulf %61, %68 : vector<8x128xf32>
    %70 = arith.addf %69, %67 : vector<8x128xf32>
    %c8 = arith.constant 8 : index
    %c0_20 = arith.constant 0 : index
    %71 = vector.load %arg6[%c8, %c0_20] : memref<64x128xf32, #tpu.memory_space<vmem>>, vector<8x128xf32>
    tpu.vector_store %arg6[%c8, %c0_20], %70 {strides = array<i32>} : memref<64x128xf32, #tpu.memory_space<vmem>>, vector<8x128xf32>,
    %72 = vector.extract_strided_slice %8 {offsets = [16, 0], sizes = [8, 384], strides = [1, 1]} : vector<64x384xf32> to vector<8x384xf32>
    %73 = arith.truncf %70 : vector<8x128xf32> to vector<8x128xbf16>
    %cst_21 = arith.constant dense<0.000000e+00> : vector<8x384xf32>
    %74 = tpu.matmul %73, %9, %cst_21 {dimension_numbers = #tpu.dot_dimension_numbers<[1], [0], [0], [1], [0, 0, 1, 1], [], []>} : vector<8x128xbf16>, vector<128x384xbf16>, vector<8x384xf32> -> vector<8x384xf32>
    %75 = vector.extract_strided_slice %72 {offsets = [0, 0], sizes = [8, 128], strides = [1, 1]} : vector<8x384xf32> to vector<8x128xf32>
    %76 = vector.extract_strided_slice %74 {offsets = [0, 0], sizes = [8, 128], strides = [1, 1]} : vector<8x384xf32> to vector<8x128xf32>
    %77 = arith.addf %75, %76 : vector<8x128xf32>
    %78 = arith.negf %77 : vector<8x128xf32>
    %79 = math.exp %78 : vector<8x128xf32>
    %cst_22 = arith.constant 1.000000e+00 : f32
    %80 = vector.broadcast %cst_22 : f32 to vector<8x128xf32>
    %81 = arith.addf %80, %79 : vector<8x128xf32>
    %82 = arith.divf %80, %81 : vector<8x128xf32>
    %83 = vector.extract_strided_slice %72 {offsets = [0, 128], sizes = [8, 128], strides = [1, 1]} : vector<8x384xf32> to vector<8x128xf32>
    %84 = vector.extract_strided_slice %74 {offsets = [0, 128], sizes = [8, 128], strides = [1, 1]} : vector<8x384xf32> to vector<8x128xf32>
    %85 = arith.addf %83, %84 : vector<8x128xf32>
    %86 = arith.negf %85 : vector<8x128xf32>
    %87 = math.exp %86 : vector<8x128xf32>
    %cst_23 = arith.constant 1.000000e+00 : f32
    %88 = vector.broadcast %cst_23 : f32 to vector<8x128xf32>
    %89 = arith.addf %88, %87 : vector<8x128xf32>
    %90 = arith.divf %88, %89 : vector<8x128xf32>
    %91 = vector.extract_strided_slice %72 {offsets = [0, 256], sizes = [8, 128], strides = [1, 1]} : vector<8x384xf32> to vector<8x128xf32>
    %92 = vector.extract_strided_slice %74 {offsets = [0, 256], sizes = [8, 128], strides = [1, 1]} : vector<8x384xf32> to vector<8x128xf32>
    %93 = arith.addf %92, %12 : vector<8x128xf32>
    %94 = arith.mulf %82, %93 : vector<8x128xf32>
    %95 = arith.addf %91, %94 : vector<8x128xf32>
    %96 = math.tanh %95 : vector<8x128xf32>
    %97 = arith.subf %70, %96 : vector<8x128xf32>
    %98 = arith.mulf %90, %97 : vector<8x128xf32>
    %99 = arith.addf %98, %96 : vector<8x128xf32>
    %c16 = arith.constant 16 : index
    %c0_24 = arith.constant 0 : index
    %100 = vector.load %arg6[%c16, %c0_24] : memref<64x128xf32, #tpu.memory_space<vmem>>, vector<8x128xf32>
    tpu.vector_store %arg6[%c16, %c0_24], %99 {strides = array<i32>} : memref<64x128xf32, #tpu.memory_space<vmem>>, vector<8x128xf32>,
    %101 = vector.extract_strided_slice %8 {offsets = [24, 0], sizes = [8, 384], strides = [1, 1]} : vector<64x384xf32> to vector<8x384xf32>
    %102 = arith.truncf %99 : vector<8x128xf32> to vector<8x128xbf16>
    %cst_25 = arith.constant dense<0.000000e+00> : vector<8x384xf32>
    %103 = tpu.matmul %102, %9, %cst_25 {dimension_numbers = #tpu.dot_dimension_numbers<[1], [0], [0], [1], [0, 0, 1, 1], [], []>} : vector<8x128xbf16>, vector<128x384xbf16>, vector<8x384xf32> -> vector<8x384xf32>
    %104 = vector.extract_strided_slice %101 {offsets = [0, 0], sizes = [8, 128], strides = [1, 1]} : vector<8x384xf32> to vector<8x128xf32>
    %105 = vector.extract_strided_slice %103 {offsets = [0, 0], sizes = [8, 128], strides = [1, 1]} : vector<8x384xf32> to vector<8x128xf32>
    %106 = arith.addf %104, %105 : vector<8x128xf32>
    %107 = arith.negf %106 : vector<8x128xf32>
    %108 = math.exp %107 : vector<8x128xf32>
    %cst_26 = arith.constant 1.000000e+00 : f32
    %109 = vector.broadcast %cst_26 : f32 to vector<8x128xf32>
    %110 = arith.addf %109, %108 : vector<8x128xf32>
    %111 = arith.divf %109, %110 : vector<8x128xf32>
    %112 = vector.extract_strided_slice %101 {offsets = [0, 128], sizes = [8, 128], strides = [1, 1]} : vector<8x384xf32> to vector<8x128xf32>
    %113 = vector.extract_strided_slice %103 {offsets = [0, 128], sizes = [8, 128], strides = [1, 1]} : vector<8x384xf32> to vector<8x128xf32>
    %114 = arith.addf %112, %113 : vector<8x128xf32>
    %115 = arith.negf %114 : vector<8x128xf32>
    %116 = math.exp %115 : vector<8x128xf32>
    %cst_27 = arith.constant 1.000000e+00 : f32
    %117 = vector.broadcast %cst_27 : f32 to vector<8x128xf32>
    %118 = arith.addf %117, %116 : vector<8x128xf32>
    %119 = arith.divf %117, %118 : vector<8x128xf32>
    %120 = vector.extract_strided_slice %101 {offsets = [0, 256], sizes = [8, 128], strides = [1, 1]} : vector<8x384xf32> to vector<8x128xf32>
    %121 = vector.extract_strided_slice %103 {offsets = [0, 256], sizes = [8, 128], strides = [1, 1]} : vector<8x384xf32> to vector<8x128xf32>
    %122 = arith.addf %121, %12 : vector<8x128xf32>
    %123 = arith.mulf %111, %122 : vector<8x128xf32>
    %124 = arith.addf %120, %123 : vector<8x128xf32>
    %125 = math.tanh %124 : vector<8x128xf32>
    %126 = arith.subf %99, %125 : vector<8x128xf32>
    %127 = arith.mulf %119, %126 : vector<8x128xf32>
    %128 = arith.addf %127, %125 : vector<8x128xf32>
    %c24 = arith.constant 24 : index
    %c0_28 = arith.constant 0 : index
    %129 = vector.load %arg6[%c24, %c0_28] : memref<64x128xf32, #tpu.memory_space<vmem>>, vector<8x128xf32>
    tpu.vector_store %arg6[%c24, %c0_28], %128 {strides = array<i32>} : memref<64x128xf32, #tpu.memory_space<vmem>>, vector<8x128xf32>,
    %130 = vector.extract_strided_slice %8 {offsets = [32, 0], sizes = [8, 384], strides = [1, 1]} : vector<64x384xf32> to vector<8x384xf32>
    %131 = arith.truncf %128 : vector<8x128xf32> to vector<8x128xbf16>
    %cst_29 = arith.constant dense<0.000000e+00> : vector<8x384xf32>
    %132 = tpu.matmul %131, %9, %cst_29 {dimension_numbers = #tpu.dot_dimension_numbers<[1], [0], [0], [1], [0, 0, 1, 1], [], []>} : vector<8x128xbf16>, vector<128x384xbf16>, vector<8x384xf32> -> vector<8x384xf32>
    %133 = vector.extract_strided_slice %130 {offsets = [0, 0], sizes = [8, 128], strides = [1, 1]} : vector<8x384xf32> to vector<8x128xf32>
    %134 = vector.extract_strided_slice %132 {offsets = [0, 0], sizes = [8, 128], strides = [1, 1]} : vector<8x384xf32> to vector<8x128xf32>
    %135 = arith.addf %133, %134 : vector<8x128xf32>
    %136 = arith.negf %135 : vector<8x128xf32>
    %137 = math.exp %136 : vector<8x128xf32>
    %cst_30 = arith.constant 1.000000e+00 : f32
    %138 = vector.broadcast %cst_30 : f32 to vector<8x128xf32>
    %139 = arith.addf %138, %137 : vector<8x128xf32>
    %140 = arith.divf %138, %139 : vector<8x128xf32>
    %141 = vector.extract_strided_slice %130 {offsets = [0, 128], sizes = [8, 128], strides = [1, 1]} : vector<8x384xf32> to vector<8x128xf32>
    %142 = vector.extract_strided_slice %132 {offsets = [0, 128], sizes = [8, 128], strides = [1, 1]} : vector<8x384xf32> to vector<8x128xf32>
    %143 = arith.addf %141, %142 : vector<8x128xf32>
    %144 = arith.negf %143 : vector<8x128xf32>
    %145 = math.exp %144 : vector<8x128xf32>
    %cst_31 = arith.constant 1.000000e+00 : f32
    %146 = vector.broadcast %cst_31 : f32 to vector<8x128xf32>
    %147 = arith.addf %146, %145 : vector<8x128xf32>
    %148 = arith.divf %146, %147 : vector<8x128xf32>
    %149 = vector.extract_strided_slice %130 {offsets = [0, 256], sizes = [8, 128], strides = [1, 1]} : vector<8x384xf32> to vector<8x128xf32>
    %150 = vector.extract_strided_slice %132 {offsets = [0, 256], sizes = [8, 128], strides = [1, 1]} : vector<8x384xf32> to vector<8x128xf32>
    %151 = arith.addf %150, %12 : vector<8x128xf32>
    %152 = arith.mulf %140, %151 : vector<8x128xf32>
    %153 = arith.addf %149, %152 : vector<8x128xf32>
    %154 = math.tanh %153 : vector<8x128xf32>
    %155 = arith.subf %128, %154 : vector<8x128xf32>
    %156 = arith.mulf %148, %155 : vector<8x128xf32>
    %157 = arith.addf %156, %154 : vector<8x128xf32>
    %c32 = arith.constant 32 : index
    %c0_32 = arith.constant 0 : index
    %158 = vector.load %arg6[%c32, %c0_32] : memref<64x128xf32, #tpu.memory_space<vmem>>, vector<8x128xf32>
    tpu.vector_store %arg6[%c32, %c0_32], %157 {strides = array<i32>} : memref<64x128xf32, #tpu.memory_space<vmem>>, vector<8x128xf32>,
    %159 = vector.extract_strided_slice %8 {offsets = [40, 0], sizes = [8, 384], strides = [1, 1]} : vector<64x384xf32> to vector<8x384xf32>
    %160 = arith.truncf %157 : vector<8x128xf32> to vector<8x128xbf16>
    %cst_33 = arith.constant dense<0.000000e+00> : vector<8x384xf32>
    %161 = tpu.matmul %160, %9, %cst_33 {dimension_numbers = #tpu.dot_dimension_numbers<[1], [0], [0], [1], [0, 0, 1, 1], [], []>} : vector<8x128xbf16>, vector<128x384xbf16>, vector<8x384xf32> -> vector<8x384xf32>
    %162 = vector.extract_strided_slice %159 {offsets = [0, 0], sizes = [8, 128], strides = [1, 1]} : vector<8x384xf32> to vector<8x128xf32>
    %163 = vector.extract_strided_slice %161 {offsets = [0, 0], sizes = [8, 128], strides = [1, 1]} : vector<8x384xf32> to vector<8x128xf32>
    %164 = arith.addf %162, %163 : vector<8x128xf32>
    %165 = arith.negf %164 : vector<8x128xf32>
    %166 = math.exp %165 : vector<8x128xf32>
    %cst_34 = arith.constant 1.000000e+00 : f32
    %167 = vector.broadcast %cst_34 : f32 to vector<8x128xf32>
    %168 = arith.addf %167, %166 : vector<8x128xf32>
    %169 = arith.divf %167, %168 : vector<8x128xf32>
    %170 = vector.extract_strided_slice %159 {offsets = [0, 128], sizes = [8, 128], strides = [1, 1]} : vector<8x384xf32> to vector<8x128xf32>
    %171 = vector.extract_strided_slice %161 {offsets = [0, 128], sizes = [8, 128], strides = [1, 1]} : vector<8x384xf32> to vector<8x128xf32>
    %172 = arith.addf %170, %171 : vector<8x128xf32>
    %173 = arith.negf %172 : vector<8x128xf32>
    %174 = math.exp %173 : vector<8x128xf32>
    %cst_35 = arith.constant 1.000000e+00 : f32
    %175 = vector.broadcast %cst_35 : f32 to vector<8x128xf32>
    %176 = arith.addf %175, %174 : vector<8x128xf32>
    %177 = arith.divf %175, %176 : vector<8x128xf32>
    %178 = vector.extract_strided_slice %159 {offsets = [0, 256], sizes = [8, 128], strides = [1, 1]} : vector<8x384xf32> to vector<8x128xf32>
    %179 = vector.extract_strided_slice %161 {offsets = [0, 256], sizes = [8, 128], strides = [1, 1]} : vector<8x384xf32> to vector<8x128xf32>
    %180 = arith.addf %179, %12 : vector<8x128xf32>
    %181 = arith.mulf %169, %180 : vector<8x128xf32>
    %182 = arith.addf %178, %181 : vector<8x128xf32>
    %183 = math.tanh %182 : vector<8x128xf32>
    %184 = arith.subf %157, %183 : vector<8x128xf32>
    %185 = arith.mulf %177, %184 : vector<8x128xf32>
    %186 = arith.addf %185, %183 : vector<8x128xf32>
    %c40 = arith.constant 40 : index
    %c0_36 = arith.constant 0 : index
    %187 = vector.load %arg6[%c40, %c0_36] : memref<64x128xf32, #tpu.memory_space<vmem>>, vector<8x128xf32>
    tpu.vector_store %arg6[%c40, %c0_36], %186 {strides = array<i32>} : memref<64x128xf32, #tpu.memory_space<vmem>>, vector<8x128xf32>,
    %188 = vector.extract_strided_slice %8 {offsets = [48, 0], sizes = [8, 384], strides = [1, 1]} : vector<64x384xf32> to vector<8x384xf32>
    %189 = arith.truncf %186 : vector<8x128xf32> to vector<8x128xbf16>
    %cst_37 = arith.constant dense<0.000000e+00> : vector<8x384xf32>
    %190 = tpu.matmul %189, %9, %cst_37 {dimension_numbers = #tpu.dot_dimension_numbers<[1], [0], [0], [1], [0, 0, 1, 1], [], []>} : vector<8x128xbf16>, vector<128x384xbf16>, vector<8x384xf32> -> vector<8x384xf32>
    %191 = vector.extract_strided_slice %188 {offsets = [0, 0], sizes = [8, 128], strides = [1, 1]} : vector<8x384xf32> to vector<8x128xf32>
    %192 = vector.extract_strided_slice %190 {offsets = [0, 0], sizes = [8, 128], strides = [1, 1]} : vector<8x384xf32> to vector<8x128xf32>
    %193 = arith.addf %191, %192 : vector<8x128xf32>
    %194 = arith.negf %193 : vector<8x128xf32>
    %195 = math.exp %194 : vector<8x128xf32>
    %cst_38 = arith.constant 1.000000e+00 : f32
    %196 = vector.broadcast %cst_38 : f32 to vector<8x128xf32>
    %197 = arith.addf %196, %195 : vector<8x128xf32>
    %198 = arith.divf %196, %197 : vector<8x128xf32>
    %199 = vector.extract_strided_slice %188 {offsets = [0, 128], sizes = [8, 128], strides = [1, 1]} : vector<8x384xf32> to vector<8x128xf32>
    %200 = vector.extract_strided_slice %190 {offsets = [0, 128], sizes = [8, 128], strides = [1, 1]} : vector<8x384xf32> to vector<8x128xf32>
    %201 = arith.addf %199, %200 : vector<8x128xf32>
    %202 = arith.negf %201 : vector<8x128xf32>
    %203 = math.exp %202 : vector<8x128xf32>
    %cst_39 = arith.constant 1.000000e+00 : f32
    %204 = vector.broadcast %cst_39 : f32 to vector<8x128xf32>
    %205 = arith.addf %204, %203 : vector<8x128xf32>
    %206 = arith.divf %204, %205 : vector<8x128xf32>
    %207 = vector.extract_strided_slice %188 {offsets = [0, 256], sizes = [8, 128], strides = [1, 1]} : vector<8x384xf32> to vector<8x128xf32>
    %208 = vector.extract_strided_slice %190 {offsets = [0, 256], sizes = [8, 128], strides = [1, 1]} : vector<8x384xf32> to vector<8x128xf32>
    %209 = arith.addf %208, %12 : vector<8x128xf32>
    %210 = arith.mulf %198, %209 : vector<8x128xf32>
    %211 = arith.addf %207, %210 : vector<8x128xf32>
    %212 = math.tanh %211 : vector<8x128xf32>
    %213 = arith.subf %186, %212 : vector<8x128xf32>
    %214 = arith.mulf %206, %213 : vector<8x128xf32>
    %215 = arith.addf %214, %212 : vector<8x128xf32>
    %c48 = arith.constant 48 : index
    %c0_40 = arith.constant 0 : index
    %216 = vector.load %arg6[%c48, %c0_40] : memref<64x128xf32, #tpu.memory_space<vmem>>, vector<8x128xf32>
    tpu.vector_store %arg6[%c48, %c0_40], %215 {strides = array<i32>} : memref<64x128xf32, #tpu.memory_space<vmem>>, vector<8x128xf32>,
    %217 = vector.extract_strided_slice %8 {offsets = [56, 0], sizes = [8, 384], strides = [1, 1]} : vector<64x384xf32> to vector<8x384xf32>
    %218 = arith.truncf %215 : vector<8x128xf32> to vector<8x128xbf16>
    %cst_41 = arith.constant dense<0.000000e+00> : vector<8x384xf32>
    %219 = tpu.matmul %218, %9, %cst_41 {dimension_numbers = #tpu.dot_dimension_numbers<[1], [0], [0], [1], [0, 0, 1, 1], [], []>} : vector<8x128xbf16>, vector<128x384xbf16>, vector<8x384xf32> -> vector<8x384xf32>
    %220 = vector.extract_strided_slice %217 {offsets = [0, 0], sizes = [8, 128], strides = [1, 1]} : vector<8x384xf32> to vector<8x128xf32>
    %221 = vector.extract_strided_slice %219 {offsets = [0, 0], sizes = [8, 128], strides = [1, 1]} : vector<8x384xf32> to vector<8x128xf32>
    %222 = arith.addf %220, %221 : vector<8x128xf32>
    %223 = arith.negf %222 : vector<8x128xf32>
    %224 = math.exp %223 : vector<8x128xf32>
    %cst_42 = arith.constant 1.000000e+00 : f32
    %225 = vector.broadcast %cst_42 : f32 to vector<8x128xf32>
    %226 = arith.addf %225, %224 : vector<8x128xf32>
    %227 = arith.divf %225, %226 : vector<8x128xf32>
    %228 = vector.extract_strided_slice %217 {offsets = [0, 128], sizes = [8, 128], strides = [1, 1]} : vector<8x384xf32> to vector<8x128xf32>
    %229 = vector.extract_strided_slice %219 {offsets = [0, 128], sizes = [8, 128], strides = [1, 1]} : vector<8x384xf32> to vector<8x128xf32>
    %230 = arith.addf %228, %229 : vector<8x128xf32>
    %231 = arith.negf %230 : vector<8x128xf32>
    %232 = math.exp %231 : vector<8x128xf32>
    %cst_43 = arith.constant 1.000000e+00 : f32
    %233 = vector.broadcast %cst_43 : f32 to vector<8x128xf32>
    %234 = arith.addf %233, %232 : vector<8x128xf32>
    %235 = arith.divf %233, %234 : vector<8x128xf32>
    %236 = vector.extract_strided_slice %217 {offsets = [0, 256], sizes = [8, 128], strides = [1, 1]} : vector<8x384xf32> to vector<8x128xf32>
    %237 = vector.extract_strided_slice %219 {offsets = [0, 256], sizes = [8, 128], strides = [1, 1]} : vector<8x384xf32> to vector<8x128xf32>
    %238 = arith.addf %237, %12 : vector<8x128xf32>
    %239 = arith.mulf %227, %238 : vector<8x128xf32>
    %240 = arith.addf %236, %239 : vector<8x128xf32>
    %241 = math.tanh %240 : vector<8x128xf32>
    %242 = arith.subf %215, %241 : vector<8x128xf32>
    %243 = arith.mulf %235, %242 : vector<8x128xf32>
    %244 = arith.addf %243, %241 : vector<8x128xf32>
    %c56 = arith.constant 56 : index
    %c0_44 = arith.constant 0 : index
    %245 = vector.load %arg6[%c56, %c0_44] : memref<64x128xf32, #tpu.memory_space<vmem>>, vector<8x128xf32>
    tpu.vector_store %arg6[%c56, %c0_44], %244 {strides = array<i32>} : memref<64x128xf32, #tpu.memory_space<vmem>>, vector<8x128xf32>,
    %c0_45 = arith.constant 0 : index
    %c0_46 = arith.constant 0 : index
    %246 = vector.load %arg7[%c0_45, %c0_46] : memref<8x128xf32, #tpu.memory_space<vmem>>, vector<8x128xf32>
    tpu.vector_store %arg7[%c0_45, %c0_46], %244 {strides = array<i32>} : memref<8x128xf32, #tpu.memory_space<vmem>>, vector<8x128xf32>,
    return
  }
  func.func @transform_0(%arg0: i32) -> (i32, i32) {
    %c0_i32 = arith.constant 0 : i32
    %c0_i32_0 = arith.constant 0 : i32
    return %arg0, %c0_i32 : i32, i32
  }
  func.func @transform_1(%arg0: i32) -> (i32, i32) {
    %c0_i32 = arith.constant 0 : i32
    %c0_i32_0 = arith.constant 0 : i32
    %c0_i32_1 = arith.constant 0 : i32
    return %c0_i32, %c0_i32_0 : i32, i32
  }
  func.func @transform_2(%arg0: i32) -> (i32, i32) {
    %c0_i32 = arith.constant 0 : i32
    %c0_i32_0 = arith.constant 0 : i32
    %c0_i32_1 = arith.constant 0 : i32
    return %c0_i32, %c0_i32_0 : i32, i32
  }
  func.func @transform_3(%arg0: i32) -> (i32, i32) {
    %c0_i32 = arith.constant 0 : i32
    %c0_i32_0 = arith.constant 0 : i32
    %c0_i32_1 = arith.constant 0 : i32
    return %c0_i32, %c0_i32_0 : i32, i32
  }
  func.func @transform_4(%arg0: i32) -> (i32, i32) {
    %c0_i32 = arith.constant 0 : i32
    %c0_i32_0 = arith.constant 0 : i32
    %c0_i32_1 = arith.constant 0 : i32
    return %c0_i32, %c0_i32_0 : i32, i32
  }
  func.func @transform_5(%arg0: i32) -> (i32, i32) {
    %c0_i32 = arith.constant 0 : i32
    %c0_i32_0 = arith.constant 0 : i32
    return %arg0, %c0_i32 : i32, i32
  }
}

</mosaic_0001>

<bundles_post_ra>
// kernel: _lambda_.1
= control target key start
LH: loop header
LB: loop body
LE: loop exit
PB: predicated region body
PF: predicated region fallthrough
CT: control target
= control target key end

     0   :  { %vm102_vm0 = vcmask 261120   ;;  %s1994_s1 = inlined_call_operand.vmem [shape: bf16[32,384], index: 1, kind: input, shape index: {}]   ;;  %s1995_s2 = inlined_call_operand.vmem [shape: bf16[128,384], index: 2, kind: input, shape index: {}]   ;;  %s1996_s0 = inlined_call_operand.vmem [shape: bf16[64,32], index: 0, kind: input, shape index: {}]   ;;  %s1997_s4 = inlined_call_operand.vmem [shape: f32[1,128], index: 4, kind: input, shape index: {}]   ;;  %s1998_s3 = inlined_call_operand.vmem [shape: f32[1,384], index: 3, kind: input, shape index: {}]   ;;  %s1999_s5 = inlined_call_operand.vmem [shape: f32[64,128], index: 5, kind: output, shape index: {}]  }
   0x1   :  { %v1106_v0 = vld [vmem:[%s1994_s1 + $0x18] sm:$0xf]  ;;  %v1248_v1 = vld [vmem:[%s1994_s1 + $0x20] sm:$0xf0]  ;;  %v1214_v2 = vld [vmem:[%s1995_s2 + $0xa8] sm:$0xf] }
   0x2   :  { %v1107_v3 = vor.u32 %v1248_v1, %v1106_v0  ;;  %v1272_v4 = vld [vmem:[%s1995_s2 + $0xb0] sm:$0xf0]  ;;  %v1094_v5 = vld [vmem:[%s1994_s1] sm:$0xf]  ;;  %v1245_v6 = vld [vmem:[%s1994_s1 + $0x8] sm:$0xf0] }
   0x3   :  { %v1406_v7 = vor.u32 %v1272_v4, %v1214_v2  ;;  %v1202_v8 = vld [vmem:[%s1995_s2 + $0x90] sm:$0xf]  ;;  %v1269_v9 = vld [vmem:[%s1995_s2 + $0x98] sm:$0xf0]  ;;  %v1095_v10 = vor.u32 %v1245_v6, %v1094_v5  ;;  %v1190_v12 = vld [vmem:[%s1995_s2 + $0x78] sm:$0xf] }
   0x4   :  { %121 = vmatpush.bf16.msra.mxu0 %v1107_v3  ;;  %v1415_v11 = vor.u32 %v1269_v9, %v1202_v8  ;;  %v1266_v13 = vld [vmem:[%s1995_s2 + $0x80] sm:$0xf0]  ;;  %v1222_v14 = vld [vmem:[%s1995_s2 + $0xb0] sm:$0xf]  ;;  %v1273_v15 = vld [vmem:[%s1995_s2 + $0xb8] sm:$0xf0] }
   0x5   :  { %368 = vmatpush.bf16.msra.mxu3 %v1406_v7  ;;  %v1432_v16 = vld [vmem:[%s1996_s0] sm:$0xff]  ;;  %v1434_v17 = vor.u32 %v1273_v15, %v1222_v14  ;;  %v1210_v18 = vld [vmem:[%s1995_s2 + $0x98] sm:$0xf]  ;;  %v1443_v20 = vor.u32 %v1266_v13, %v1190_v12  ;;  %v1263_v23 = vld [vmem:[%s1995_s2 + $0x68] sm:$0xf0]  ;;  %v1357_v13 = vmov 0.0|0.0  }
   0x6   :  { %v1270_v19 = vld [vmem:[%s1995_s2 + $0xa0] sm:$0xf0]  ;;  %v1178_v22 = vld [vmem:[%s1995_s2 + $0x60] sm:$0xf]  ;;  %v1267_v25 = vld [vmem:[%s1995_s2 + $0x88] sm:$0xf0] }
   0x7   :  { %v1446_v21 = vor.u32 %v1270_v19, %v1210_v18  ;;  %v1198_v24 = vld [vmem:[%s1995_s2 + $0x80] sm:$0xf]  ;;  %v1463_v26 = vor.u32 %v1263_v23, %v1178_v22  ;;  %v1166_v27 = vld [vmem:[%s1995_s2 + $0x48] sm:$0xf]  ;;  %v1260_v29 = vld [vmem:[%s1995_s2 + $0x50] sm:$0xf0] }
   0x8   :  { %122 = vmatpush.bf16.msra.mxu0 %v1095_v10  ;;  %v1469_v28 = vor.u32 %v1267_v25, %v1198_v24  ;;  %v1186_v30 = vld [vmem:[%s1995_s2 + $0x68] sm:$0xf]  ;;  %v1264_v31 = vld [vmem:[%s1995_s2 + $0x70] sm:$0xf0]  ;;  %v1481_v32 = vor.u32 %v1260_v29, %v1166_v27  ;;  %v1154_v33 = vld [vmem:[%s1995_s2 + $0x30] sm:$0xf] }
   0x9   :  { %369 = vmatpush.bf16.msra.mxu3 %v1415_v11  ;;  %v1487_v34 = vor.u32 %v1264_v31, %v1186_v30  ;;  %v1257_v35 = vld [vmem:[%s1995_s2 + $0x38] sm:$0xf0]  ;;  %v1108_v37 = vld [vmem:[%s1994_s1 + $0x24] sm:$0xf0]  ;;  %v1142_v40 = vld [vmem:[%s1995_s2 + $0x18] sm:$0xf] }
   0xa   :  { %v1247_v36 = vld [vmem:[%s1994_s1 + $0x1c] sm:$0xf]  ;;  %v1499_v39 = vor.u32 %v1257_v35, %v1154_v33  ;;  %v1254_v41 = vld [vmem:[%s1995_s2 + $0x20] sm:$0xf0]  ;;  %v1174_v42 = vld [vmem:[%s1995_s2 + $0x50] sm:$0xf] }
   0xb   :  { %1116 = vmatmul.msk.bf16.vlgmr.msra.gmra.mxu0 %vm102_vm0, %v1432_v16  ;;  %v1111_v38 = vor.u32 %v1247_v36, %v1108_v37  ;;  %v1261_v43 = vld [vmem:[%s1995_s2 + $0x58] sm:$0xf0]  ;;  %v1244_v44 = vld [vmem:[%s1994_s1 + $0x4] sm:$0xf]  ;;  %v1520_v45 = vld [vmem:[%s1996_s0 + $0x8] sm:$0xff]  ;;  %v1528_v49 = vor.u32 %v1254_v41, %v1142_v40 }
   0xc   :  { %394 = vmatpush.bf16.msrb.mxu0 %v1434_v17  ;;  %v1522_v46 = vor.u32 %v1261_v43, %v1174_v42  ;;  %v1096_v47 = vld [vmem:[%s1994_s1 + $0xc] sm:$0xf0]  ;;  %v1130_v50 = vld [vmem:[%s1995_s2] sm:$0xf]  ;;  %v1251_v51 = vld [vmem:[%s1995_s2 + $0x8] sm:$0xf0] }
   0xd   :  { %370 = vmatpush.bf16.msra.mxu3 %v1443_v20  ;;  %150 = vmatpush.bf16.msra.mxu1 %v1111_v38  ;;  %v1099_v48 = vor.u32 %v1244_v44, %v1096_v47  ;;  %v1271_v52 = vld [vmem:[%s1995_s2 + $0xac] sm:$0xf]  ;;  %v1216_v53 = vld [vmem:[%s1995_s2 + $0xb4] sm:$0xf0]  ;;  %v1547_v54 = vor.u32 %v1251_v51, %v1130_v50  ;;  %v1258_v57 = vld [vmem:[%s1995_s2 + $0x40] sm:$0xf0] }
   0xe   :  { %v1551_v55 = vor.u32 %v1271_v52, %v1216_v53  ;;  %v1162_v56 = vld [vmem:[%s1995_s2 + $0x38] sm:$0xf]  ;;  %v1114_v58 = vld [vmem:[%s1994_s1 + $0x20] sm:$0xf]  ;;  %v1268_v59 = vld [vmem:[%s1995_s2 + $0x94] sm:$0xf] }
   0xf   :  { %v1204_v60 = vld [vmem:[%s1995_s2 + $0x9c] sm:$0xf0]  ;;  %v1568_v61 = vor.u32 %v1258_v57, %v1162_v56  ;;  %v1249_v62 = vld [vmem:[%s1994_s1 + $0x28] sm:$0xf0]  ;;  %v1102_v0 = vld [vmem:[%s1994_s1 + $0x8] sm:$0xf] }
  0x10   :  { %395 = vmatpush.bf16.msrb.mxu0 %v1446_v21  ;;  %v1115_v63 = vor.u32 %v1249_v62, %v1114_v58  ;;  %v1246_v1 = vld [vmem:[%s1994_s1 + $0x10] sm:$0xf0]  ;;  %v1150_v2 = vld [vmem:[%s1995_s2 + $0x20] sm:$0xf]  ;;  %v1586_v3 = vor.u32 %v1268_v59, %v1204_v60  ;;  %v1255_v5 = vld [vmem:[%s1995_s2 + $0x28] sm:$0xf0] }
  0x11   :  { %371 = vmatpush.bf16.msra.mxu3 %v1463_v26  ;;  %151 = vmatpush.bf16.msra.mxu1 %v1099_v48  ;;  %v1103_v4 = vor.u32 %v1246_v1, %v1102_v0  ;;  %v1138_v6 = vld [vmem:[%s1995_s2 + $0x8] sm:$0xf]  ;;  %v1252_v8 = vld [vmem:[%s1995_s2 + $0x10] sm:$0xf0]  ;;  %v1265_v9 = vld [vmem:[%s1995_s2 + $0x7c] sm:$0xf]  ;;  %v1603_v12 = vor.u32 %v1255_v5, %v1150_v2 }
  0x12   :  { %179 = vmatpush.bf16.msra.mxu2 %v1115_v63  ;;  %v1192_v10 = vld [vmem:[%s1995_s2 + $0x84] sm:$0xf0]  ;;  %v1608_v14 = vor.u32 %v1252_v8, %v1138_v6  ;;  %v1242_v18 = vld [vmem:[%s1996_s0 + $0x10] sm:$0xff]  ;;  %v1262_v19 = vld [vmem:[%s1995_s2 + $0x64] sm:$0xf] }
  0x13   :  { %v1611_v15 = vor.u32 %v1265_v9, %v1192_v10  ;;  %v1180_v22 = vld [vmem:[%s1995_s2 + $0x6c] sm:$0xf0]  ;;  %v1259_v24 = vld [vmem:[%s1995_s2 + $0x4c] sm:$0xf]  ;;  %v1168_v25 = vld [vmem:[%s1995_s2 + $0x54] sm:$0xf0] }
  0x14   :  { %396 = vmatpush.bf16.msrb.mxu0 %v1469_v28  ;;  %1120 = vmatmul.msk.bf16.vlgmr.msra.gmra.mxu1 %vm102_vm0, %v1432_v16  ;;  %v1628_v23 = vor.u32 %v1262_v19, %v1180_v22  ;;  %v1256_v27 = vld [vmem:[%s1995_s2 + $0x34] sm:$0xf]  ;;  %v1156_v29 = vld [vmem:[%s1995_s2 + $0x3c] sm:$0xf0]  ;;  %v1253_v31 = vld [vmem:[%s1995_s2 + $0x1c] sm:$0xf] }
  0x15   :  { %372 = vmatpush.bf16.msra.mxu3 %v1481_v32  ;;  %456 = vmatpush.bf16.msrb.mxu1 %v1406_v7  ;;  %v1655_v30 = vor.u32 %v1256_v27, %v1156_v29  ;;  %v1144_v33 = vld [vmem:[%s1995_s2 + $0x24] sm:$0xf0]  ;;  %v1243_v36 = vld [vmem:[%s1996_s0 + $0x18] sm:$0xff]  ;;  %v1250_v37 = vld [vmem:[%s1995_s2 + $0x4] sm:$0xf] }
  0x16   :  { %180 = vmatpush.bf16.msra.mxu2 %v1103_v4  ;;  %v1667_v35 = vor.u32 %v1253_v31, %v1144_v33  ;;  %v1132_v38 = vld [vmem:[%s1995_s2 + $0xc] sm:$0xf0]  ;;  %v42_v42 = vld [vmem:[%s1998_s3] sm:$0x7] }
  0x17   :  { %v1685_v40 = vor.u32 %v1250_v37, %v1132_v38  ;;  %v44_v43 = vperm.slane %v42_v42, 0  ;;  %v1756_v8 = vperm.slane %v42_v42, 1  ;;  %v1764_v29 = vld [vmem:[%s1997_s4] ss:$0 sm:$0xff] }
  0x18   :  { %397 = vmatpush.bf16.msrb.mxu0 %v1487_v34 }
  0x19   :  { %373 = vmatpush.bf16.msra.mxu3 %v1499_v39  ;;  %457 = vmatpush.bf16.msrb.mxu1 %v1415_v11 }
  0x1a   :  { %469 = vmatpush.bf16.msrb.mxu2 %v1551_v55 }
  0x1b   :  { %1117 = vmatmul.msk.bf16.gmra.mxu0 %vm102_vm0, %v1520_v45  ;;  %1124 = vmatmul.msk.bf16.vlgmr.msra.gmra.mxu2 %vm102_vm0, %v1432_v16  ;;  %v1643_v16 = vor.u32 %v1259_v24, %v1168_v25 }
  0x1c   :  { %398 = vmatpush.bf16.msrb.mxu0 %v1522_v46 }
  0x1d   :  { %374 = vmatpush.bf16.msra.mxu3 %v1528_v49  ;;  %458 = vmatpush.bf16.msrb.mxu1 %v1443_v20 }
  0x1e   :  { %470 = vmatpush.bf16.msrb.mxu2 %v1586_v3 }
  0x20   :  { %399 = vmatpush.bf16.msrb.mxu0 %v1568_v61 }
  0x21   :  { %375 = vmatpush.bf16.msra.mxu3 %v1547_v54  ;;  %459 = vmatpush.bf16.msrb.mxu1 %v1463_v26 }
  0x22   :  { %471 = vmatpush.bf16.msrb.mxu2 %v1611_v15 }
  0x24   :  { %376 = vmatmul.bf16.vlgmr.msra.gmra.mxu3 %v1357_v13  ;;  %400 = vmatpush.bf16.msrb.mxu0 %v1603_v12 }
  0x25   :  { %381 = vmatpush.bf16.msrb.mxu3 %v1551_v55  ;;  %460 = vmatpush.bf16.msrb.mxu1 %v1481_v32 }
  0x26   :  { %1121 = vmatmul.msk.bf16.gmra.mxu1 %vm102_vm0, %v1520_v45  ;;  %472 = vmatpush.bf16.msrb.mxu2 %v1628_v23 }
  0x28   :  { %401 = vmatpush.bf16.msrb.mxu0 %v1608_v14 }
  0x29   :  { %382 = vmatpush.bf16.msrb.mxu3 %v1586_v3  ;;  %461 = vmatpush.bf16.msrb.mxu1 %v1499_v39 }
  0x2a   :  { %473 = vmatpush.bf16.msrb.mxu2 %v1643_v16 }
  0x2b   :  { %1118 = vmatmul.msk.bf16.gmra.mxu0 %vm102_vm0, %v1242_v18  ;;  %1125 = vmatmul.msk.bf16.gmra.mxu2 %vm102_vm0, %v1520_v45 }
  0x2c   :  { %544 = vmatpush.bf16.msra.mxu0 %v1406_v7 }
  0x2d   :  { %383 = vmatpush.bf16.msrb.mxu3 %v1611_v15  ;;  %462 = vmatpush.bf16.msrb.mxu1 %v1528_v49 }
  0x2e   :  { %474 = vmatpush.bf16.msrb.mxu2 %v1655_v30 }
  0x30   :  { %545 = vmatpush.bf16.msra.mxu0 %v1415_v11 }
  0x31   :  { %384 = vmatpush.bf16.msrb.mxu3 %v1628_v23  ;;  %463 = vmatpush.bf16.msrb.mxu1 %v1547_v54 }
  0x32   :  { %475 = vmatpush.bf16.msrb.mxu2 %v1667_v35 }
  0x34   :  { %546 = vmatpush.bf16.msra.mxu0 %v1443_v20 }
  0x35   :  { %385 = vmatpush.bf16.msrb.mxu3 %v1643_v16  ;;  %557 = vmatpush.bf16.msra.mxu1 %v1551_v55 }
  0x36   :  { %1122 = vmatmul.msk.bf16.gmra.mxu1 %vm102_vm0, %v1242_v18  ;;  %476 = vmatpush.bf16.msrb.mxu2 %v1685_v40 }
  0x38   :  { %547 = vmatpush.bf16.msra.mxu0 %v1463_v26 }
  0x39   :  { %386 = vmatpush.bf16.msrb.mxu3 %v1655_v30  ;;  %558 = vmatpush.bf16.msra.mxu1 %v1586_v3 }
  0x3a   :  { %570 = vmatpush.bf16.msra.mxu2 %v1434_v17 }
  0x3b   :  { %1119 = vmatmul.msk.bf16.gmra.mxu0 %vm102_vm0, %v1243_v36  ;;  %1126 = vmatmul.msk.bf16.gmra.mxu2 %vm102_vm0, %v1242_v18 }
  0x3c   :  { %548 = vmatpush.bf16.msra.mxu0 %v1481_v32 }
  0x3d   :  { %387 = vmatpush.bf16.msrb.mxu3 %v1667_v35  ;;  %559 = vmatpush.bf16.msra.mxu1 %v1611_v15 }
  0x3e   :  { %571 = vmatpush.bf16.msra.mxu2 %v1446_v21 }
  0x40   :  { %549 = vmatpush.bf16.msra.mxu0 %v1499_v39 }
  0x41   :  { %388 = vmatpush.bf16.msrb.mxu3 %v1685_v40  ;;  %560 = vmatpush.bf16.msra.mxu1 %v1628_v23 }
  0x42   :  { %572 = vmatpush.bf16.msra.mxu2 %v1469_v28 }
  0x44   :  { %389 = vmatmul.bf16.vlgmr.msrb.gmra.mxu3 %v1357_v13  ;;  %550 = vmatpush.bf16.msra.mxu0 %v1528_v49 }
  0x45   :  { %482 = vmatpush.bf16.msra.mxu3 %v1434_v17  ;;  %561 = vmatpush.bf16.msra.mxu1 %v1643_v16 }
  0x46   :  { %1123 = vmatmul.msk.bf16.gmra.mxu1 %vm102_vm0, %v1243_v36  ;;  %573 = vmatpush.bf16.msra.mxu2 %v1487_v34 }
  0x48   :  { %551 = vmatpush.bf16.msra.mxu0 %v1547_v54 }
  0x49   :  { %483 = vmatpush.bf16.msra.mxu3 %v1446_v21  ;;  %562 = vmatpush.bf16.msra.mxu1 %v1655_v30 }
  0x4a   :  { %574 = vmatpush.bf16.msra.mxu2 %v1522_v46 }
  0x4b   :  { %402 = vmatmul.bf16.vlgmr.msrb.gmra.mxu0 %v1357_v13  ;;  %1127 = vmatmul.msk.bf16.gmra.mxu2 %vm102_vm0, %v1243_v36 }
  0x4c   :  { %645 = vmatpush.bf16.msrb.mxu0 %v1551_v55 }
  0x4d   :  { %484 = vmatpush.bf16.msra.mxu3 %v1469_v28  ;;  %563 = vmatpush.bf16.msra.mxu1 %v1667_v35 }
  0x4e   :  { %575 = vmatpush.bf16.msra.mxu2 %v1568_v61 }
  0x50   :  { %646 = vmatpush.bf16.msrb.mxu0 %v1586_v3 }
  0x51   :  { %485 = vmatpush.bf16.msra.mxu3 %v1487_v34  ;;  %564 = vmatpush.bf16.msra.mxu1 %v1685_v40 }
  0x52   :  { %576 = vmatpush.bf16.msra.mxu2 %v1603_v12 }
  0x54   :  { %647 = vmatpush.bf16.msrb.mxu0 %v1611_v15 }
  0x55   :  { %486 = vmatpush.bf16.msra.mxu3 %v1522_v46 }
  0x56   :  { %577 = vmatpush.bf16.msra.mxu2 %v1608_v14 }
  0x58   :  { %648 = vmatpush.bf16.msrb.mxu0 %v1628_v23 }
  0x59   :  { %487 = vmatpush.bf16.msra.mxu3 %v1568_v61 }
  0x5c   :  { %649 = vmatpush.bf16.msrb.mxu0 %v1643_v16 }
  0x5d   :  { %488 = vmatpush.bf16.msra.mxu3 %v1603_v12 }
  0x60   :  { %650 = vmatpush.bf16.msrb.mxu0 %v1655_v30 }
  0x61   :  { %489 = vmatpush.bf16.msra.mxu3 %v1608_v14 }
  0x64   :  { %651 = vmatpush.bf16.msrb.mxu0 %v1667_v35 }
  0x65   :  { %632 = vmatpush.bf16.msrb.mxu3 %v1406_v7 }
  0x68   :  { %652 = vmatpush.bf16.msrb.mxu0 %v1685_v40 }
  0x69   :  { %633 = vmatpush.bf16.msrb.mxu3 %v1415_v11 }
  0x6d   :  { %634 = vmatpush.bf16.msrb.mxu3 %v1443_v20 }
  0x71   :  { %635 = vmatpush.bf16.msrb.mxu3 %v1463_v26 }
  0x75   :  { %636 = vmatpush.bf16.msrb.mxu3 %v1481_v32 }
  0x79   :  { %637 = vmatpush.bf16.msrb.mxu3 %v1499_v39 }
  0x7d   :  { %638 = vmatpush.bf16.msrb.mxu3 %v1528_v49 }
  0x81   :  { %639 = vmatpush.bf16.msrb.mxu3 %v1547_v54 }
  0x88   :  { %v124_v41 = vpop.f32.mrf.mxu0 }
  0x89   :  { %v125_v52 = vadd.f32 %v124_v41, %v44_v43 }
  0x90   :  { %v126_v44 = vpop.f32.mrf.mxu0 }
  0x91   :  { %v1744_v45 = vadd.f32 %v126_v44, %v44_v43  ;;  %v153_v9 = vpop.f32.mrf.mxu1 }
  0x92   :  { %v154_v18 = vadd.f32 %v153_v9, %v1756_v8 }
  0x98   :  { %v129_v47 = vpop.f32.mrf.mxu0 }
  0x99   :  { %v1746_v48 = vadd.f32 %v129_v47, %v44_v43 }
  0xa0   :  { %v131_v50 = vpop.f32.mrf.mxu0 }
  0xa1   :  { %v1748_v51 = vadd.f32 %v131_v50, %v44_v43  ;;  %v182_v50 = vpop.f32.mrf.mxu2 }
  0xa7   :  { %v377_v53 = vpop.f32.mrf.mxu3 }
  0xa8   :  { %v407_v56 = vadd.f32 %v377_v53, %v125_v52  ;;  %v134_v57 = vpop.f32.mrf.mxu0 }
  0xa9   :  { %v1750_v58 = vadd.f32 %v134_v57, %v44_v43 }
  0xaa   :  { %v1224_v59 = vmul.f32 -1.442695, %v407_v56 }
  0xac   :  { %1276 = vpow2.f32 %v1224_v59 }
  0xaf   :  { %v379_v60 = vpop.f32.mrf.mxu3 }
  0xb0   :  { %v136_v62 = vpop.f32.mrf.mxu0 }
  0xb1   :  { %v1752_v63 = vadd.f32 %v136_v62, %v44_v43 }
  0xb2   :  { %v1277_v0 = vpop.eup %1276 }
  0xb3   :  { %v411_v1 = vadd.f32 1.0, %v1277_v0 }
  0xb5   :  { %1278 = vrcp.f32 %v411_v1  ;;  %v423_v36 = vand.u32 2147483648, %v411_v1  ;;  %vm417_vm2 = vweird.f32 %v411_v1  ;;  %v421_v37 = vand.u32 2147483647, %v411_v1 }
  0xb7   :  { %v424_v47 = vor.u32 1.1754944e-38, %v423_v36  ;;  %vm422_vm4 = vcmp.eq.f32.partialorder %v421_v37, 8.507059e+37  ;;  %v184_v36 = vpop.f32.mrf.mxu2 }
  0xb8   :  { %v139_v2 = vpop.f32.mrf.mxu0 }
  0xb9   :  { %v1754_v4 = vadd.f32 %v139_v2, %v44_v43 }
  0xbb   :  { %v1279_v5 = vpop.eup %1278 }
  0xbc   :  { %v413_v6 = vmul.f32 %v1279_v5, %v411_v1  ;;  %vm418_vm1 = vweird.f32 %v1279_v5 }
  0xbd   :  { %vm419_vm3 = vmor %vm417_vm2, %vm418_vm1 }
  0xbe   :  { %v414_v13 = vsub.f32 1.0, %v413_v6 }
  0xc0   :  { %v141_v10 = vpop.f32.mrf.mxu0  ;;  %v415_v24 = vmul.f32 %v1279_v5, %v414_v13 }
  0xc1   :  { %v1759_v19 = vadd.f32 %v141_v10, %v44_v43  ;;  %v1767_v43 = vperm.slane %v42_v42, 2 }
  0xc2   :  { %v416_v33 = vadd.f32 %v1279_v5, %v415_v24 }
  0xc3   :  { %2000 = vst [vmem:[#allocation3_spill] sm:$0xff] %v1759_v19  ;;  %v183_v59 = vadd.f32 %v182_v50, %v1767_v43 }
  0xc4   :  { %v420_v38 = vsel %vm419_vm3, %v1279_v5, %v416_v33  ;;  %v155_v33 = vpop.f32.mrf.mxu1 }
  0xc5   :  { %v425_v53 = vsel %vm422_vm4, %v424_v47, %v420_v38  ;;  %v1804_v38 = vpop.f32.mrf.mxu2 }
  0xc7   :  { %v390_v22 = vpop.f32.mrf.mxu3 }
  0xc8   :  { %v427_v25 = vadd.f32 %v390_v22, %v154_v18  ;;  %v403_v31 = vpop.f32.mrf.mxu0 }
  0xc9   :  { %v447_v41 = vadd.f32 %v1764_v29, %v403_v31 }
  0xca   :  { %v1225_v27 = vmul.f32 -1.442695, %v427_v25 }
  0xcb   :  { %v448_v57 = vmul.f32 %v447_v41, %v425_v53 }
  0xcc   :  { %1280 = vpow2.f32 %v1225_v27  ;;  %v1802_v37 = vpop.f32.mrf.mxu1 }
  0xcd   :  { %v449_v62 = vadd.f32 %v448_v57, %v183_v59 }
  0xcf   :  { %v392_v44 = vpop.f32.mrf.mxu3 }
  0xd0   :  { %v405_v60 = vpop.f32.mrf.mxu0  ;;  %v1808_v44 = vpop.f32.mrf.mxu2 }
  0xd2   :  { %v1281_v52 = vpop.eup %1280 }
  0xd3   :  { %v431_v56 = vadd.f32 1.0, %v1281_v52 }
  0xd4   :  { %v1806_v41 = vpop.f32.mrf.mxu1 }
  0xd5   :  { %1282 = vrcp.f32 %v431_v56  ;;  %v443_v5 = vand.u32 2147483648, %v431_v56  ;;  %v441_v6 = vand.u32 2147483647, %v431_v56  ;;  %vm437_vm6 = vweird.f32 %v431_v56 }
  0xd6   :  { %1284 = vtanh.f32 %v449_v62 }
  0xd7   :  { %v444_v13 = vor.u32 1.1754944e-38, %v443_v5  ;;  %vm442_vm8 = vcmp.eq.f32.partialorder %v441_v6, 8.507059e+37 }
  0xd8   :  { %v1812_v50 = vpop.f32.mrf.mxu2 }
  0xdb   :  { %v1283_v0 = vpop.eup %1282 }
  0xdc   :  { %v433_v1 = vmul.f32 %v1283_v0, %v431_v56  ;;  %vm438_vm5 = vweird.f32 %v1283_v0  ;;  %v1285_v9 = vpop.eup %1284  ;;  %v1810_v47 = vpop.f32.mrf.mxu1 }
  0xdd   :  { %vm439_vm7 = vmor %vm437_vm6, %vm438_vm5  ;;  %v451_v18 = vsub.f32 0.0, %v1285_v9 }
  0xde   :  { %v434_v2 = vsub.f32 1.0, %v433_v1 }
  0xe0   :  { %v435_v42 = vmul.f32 %v1283_v0, %v434_v2  ;;  %v1816_v53 = vpop.f32.mrf.mxu2  ;;  %v156_v2 = vadd.f32 %v155_v33, %v1756_v8 }
  0xe2   :  { %v436_v10 = vadd.f32 %v1283_v0, %v435_v42 }
  0xe4   :  { %v440_v22 = vsel %vm439_vm7, %v1283_v0, %v436_v10  ;;  %v1814_v52 = vpop.f32.mrf.mxu1 }
  0xe5   :  { %v445_v24 = vsel %vm442_vm8, %v444_v13, %v440_v22 }
  0xe6   :  { %v452_v25 = vmul.f32 %v451_v18, %v445_v24 }
  0xe8   :  { %v1770_v27 = vadd.f32 %v1285_v9, %v452_v25  ;;  %v1820_v57 = vpop.f32.mrf.mxu2 }
  0xe9   :  { %2001 = vst [vmem:[#allocation4_spill] sm:$0xff] %v1820_v57 }
  0xea   :  { %454 = vst [vmem:[%s1999_s5] sm:$0xff] %v1770_v27  ;;  %v455_v31 = vpack.c.bf16 %v1770_v27, %v1770_v27 }
  0xec   :  { %464 = vmatmul.bf16.vlgmr.msrb.gmra.mxu1 %v455_v31  ;;  %477 = vmatmul.bf16.vlgmr.msrb.gmra.mxu2 %v455_v31  ;;  %v1818_v56 = vpop.f32.mrf.mxu1 }
  0xed   :  { %490 = vmatmul.bf16.vlgmr.msra.gmra.mxu3 %v455_v31  ;;  %658 = vmatpush.bf16.msrb.mxu1 %v1434_v17 }
  0xee   :  { %720 = vmatpush.bf16.msrb.mxu2 %v1406_v7  ;;  %733 = vmatpush.bf16.msra.mxu3 %v1551_v55 }
  0xf0   :  { %v1824_v60 = vpop.f32.mrf.mxu2 }
  0xf1   :  { %659 = vmatpush.bf16.msrb.mxu1 %v1446_v21  ;;  %2003 = vst [vmem:[#allocation6_spill] sm:$0xff] %v1824_v60 }
  0xf2   :  { %721 = vmatpush.bf16.msrb.mxu2 %v1415_v11  ;;  %734 = vmatpush.bf16.msra.mxu3 %v1586_v3 }
  0xf4   :  { %v1822_v59 = vpop.f32.mrf.mxu1 }
  0xf5   :  { %660 = vmatpush.bf16.msrb.mxu1 %v1469_v28  ;;  %2002 = vst [vmem:[#allocation5_spill] sm:$0xff] %v1822_v59 }
  0xf6   :  { %722 = vmatpush.bf16.msrb.mxu2 %v1443_v20  ;;  %735 = vmatpush.bf16.msra.mxu3 %v1611_v15 }
  0xf9   :  { %661 = vmatpush.bf16.msrb.mxu1 %v1487_v34 }
  0xfa   :  { %723 = vmatpush.bf16.msrb.mxu2 %v1463_v26  ;;  %736 = vmatpush.bf16.msra.mxu3 %v1628_v23 }
  0xfd   :  { %662 = vmatpush.bf16.msrb.mxu1 %v1522_v46 }
  0xfe   :  { %724 = vmatpush.bf16.msrb.mxu2 %v1481_v32  ;;  %737 = vmatpush.bf16.msra.mxu3 %v1643_v16 }
 0x101   :  { %663 = vmatpush.bf16.msrb.mxu1 %v1568_v61 }
 0x102   :  { %725 = vmatpush.bf16.msrb.mxu2 %v1499_v39  ;;  %738 = vmatpush.bf16.msra.mxu3 %v1655_v30 }
 0x105   :  { %664 = vmatpush.bf16.msrb.mxu1 %v1603_v12 }
 0x106   :  { %726 = vmatpush.bf16.msrb.mxu2 %v1528_v49  ;;  %739 = vmatpush.bf16.msra.mxu3 %v1667_v35 }
 0x109   :  { %665 = vmatpush.bf16.msrb.mxu1 %v1608_v14 }
 0x10a   :  { %727 = vmatpush.bf16.msrb.mxu2 %v1547_v54  ;;  %740 = vmatpush.bf16.msra.mxu3 %v1685_v40 }
 0x169   :  { %v465_v62 = vpop.f32.mrf.mxu1 }
 0x16a   :  { %v495_v0 = vadd.f32 %v465_v62, %v1744_v45 }
 0x16c   :  { %v1226_v1 = vmul.f32 -1.442695, %v495_v0 }
 0x16e   :  { %1286 = vpow2.f32 %v1226_v1 }
 0x16f   :  { %v478_v5 = vpop.f32.mrf.mxu2 }
 0x170   :  { %v515_v42 = vadd.f32 %v478_v5, %v156_v2  ;;  %v491_v6 = vpop.f32.mrf.mxu3 }
 0x171   :  { %v467_v9 = vpop.f32.mrf.mxu1 }
 0x172   :  { %v1227_v10 = vmul.f32 -1.442695, %v515_v42 }
 0x174   :  { %v1287_v13 = vpop.eup %1286  ;;  %1288 = vpow2.f32 %v1227_v10 }
 0x175   :  { %v499_v18 = vadd.f32 1.0, %v1287_v13 }
 0x177   :  { %1290 = vrcp.f32 %v499_v18  ;;  %v480_v22 = vpop.f32.mrf.mxu2  ;;  %v511_v0 = vand.u32 2147483648, %v499_v18  ;;  %v509_v1 = vand.u32 2147483647, %v499_v18  ;;  %vm505_vm10 = vweird.f32 %v499_v18 }
 0x178   :  { %v493_v24 = vpop.f32.mrf.mxu3  ;;  %v535_v22 = vadd.f32 %v1764_v29, %v491_v6 }
 0x179   :  { %v512_v42 = vor.u32 1.1754944e-38, %v511_v0  ;;  %vm510_vm12 = vcmp.eq.f32.partialorder %v509_v1, 8.507059e+37 }
 0x17a   :  { %v1289_v25 = vpop.eup %1288 }
 0x17b   :  { %v519_v31 = vadd.f32 1.0, %v1289_v25  ;;  %v185_v25 = vadd.f32 %v184_v36, %v1767_v43 }
 0x17d   :  { %v1291_v60 = vpop.eup %1290  ;;  %1292 = vrcp.f32 %v519_v31  ;;  %v531_v57 = vand.u32 2147483648, %v519_v31  ;;  %vm525_vm14 = vweird.f32 %v519_v31 }
 0x17e   :  { %v501_v45 = vmul.f32 %v1291_v60, %v499_v18  ;;  %vm506_vm9 = vweird.f32 %v1291_v60 }
 0x17f   :  { %vm507_vm11 = vmor %vm505_vm10, %vm506_vm9 }
 0x180   :  { %v502_v62 = vsub.f32 1.0, %v501_v45 }
 0x182   :  { %v503_v33 = vmul.f32 %v1291_v60, %v502_v62 }
 0x183   :  { %v1293_v2 = vpop.eup %1292 }
 0x184   :  { %v521_v5 = vmul.f32 %v1293_v2, %v519_v31  ;;  %v504_v9 = vadd.f32 %v1291_v60, %v503_v33  ;;  %vm526_vm13 = vweird.f32 %v1293_v2  ;;  %v529_v33 = vand.u32 2147483647, %v519_v31 }
 0x185   :  { %vm527_vm15 = vmor %vm525_vm14, %vm526_vm13 }
 0x186   :  { %v522_v10 = vsub.f32 1.0, %v521_v5  ;;  %v508_v13 = vsel %vm507_vm11, %v1291_v60, %v504_v9  ;;  %v532_v5 = vor.u32 1.1754944e-38, %v531_v57  ;;  %vm530_vm0 = vcmp.eq.f32.partialorder %v529_v33, 8.507059e+37 }
 0x187   :  { %v513_v24 = vsel %vm510_vm12, %v512_v42, %v508_v13 }
 0x188   :  { %v536_v19 = vmul.f32 %v535_v22, %v513_v24  ;;  %v523_v45 = vmul.f32 %v1293_v2, %v522_v10 }
 0x18a   :  { %v537_v59 = vadd.f32 %v536_v19, %v185_v25  ;;  %v524_v62 = vadd.f32 %v1293_v2, %v523_v45 }
 0x18c   :  { %1294 = vtanh.f32 %v537_v59  ;;  %v528_v18 = vsel %vm527_vm15, %v1293_v2, %v524_v62 }
 0x18d   :  { %v533_v6 = vsel %vm530_vm0, %v532_v5, %v528_v18 }
 0x192   :  { %v1295_v0 = vpop.eup %1294 }
 0x193   :  { %v539_v60 = vsub.f32 %v1770_v27, %v1295_v0  ;;  %v159_v27 = vadd.f32 %v1802_v37, %v1756_v8 }
 0x195   :  { %v540_v1 = vmul.f32 %v539_v60, %v533_v6 }
 0x197   :  { %v1831_v9 = vadd.f32 %v1295_v0, %v540_v1 }
 0x199   :  { %542 = vst [vmem:[%s1999_s5 + $0x8] sm:$0xff] %v1831_v9  ;;  %v543_v19 = vpack.c.bf16 %v1831_v9, %v1831_v9 }
 0x19b   :  { %552 = vmatmul.bf16.vlgmr.msra.gmra.mxu0 %v543_v19  ;;  %565 = vmatmul.bf16.vlgmr.msra.gmra.mxu1 %v543_v19 }
 0x19c   :  { %578 = vmatmul.bf16.vlgmr.msra.gmra.mxu2 %v543_v19  ;;  %746 = vmatpush.bf16.msra.mxu0 %v1434_v17 }
 0x19d   :  { %808 = vmatpush.bf16.msra.mxu1 %v1406_v7  ;;  %821 = vmatpush.bf16.msra.mxu2 %v1551_v55 }
 0x1a0   :  { %747 = vmatpush.bf16.msra.mxu0 %v1446_v21 }
 0x1a1   :  { %809 = vmatpush.bf16.msra.mxu1 %v1415_v11  ;;  %822 = vmatpush.bf16.msra.mxu2 %v1586_v3 }
 0x1a4   :  { %748 = vmatpush.bf16.msra.mxu0 %v1469_v28 }
 0x1a5   :  { %810 = vmatpush.bf16.msra.mxu1 %v1443_v20  ;;  %823 = vmatpush.bf16.msra.mxu2 %v1611_v15 }
 0x1a8   :  { %749 = vmatpush.bf16.msra.mxu0 %v1487_v34 }
 0x1a9   :  { %811 = vmatpush.bf16.msra.mxu1 %v1463_v26  ;;  %824 = vmatpush.bf16.msra.mxu2 %v1628_v23 }
 0x1ac   :  { %750 = vmatpush.bf16.msra.mxu0 %v1522_v46 }
 0x1ad   :  { %812 = vmatpush.bf16.msra.mxu1 %v1481_v32  ;;  %825 = vmatpush.bf16.msra.mxu2 %v1643_v16 }
 0x1b0   :  { %751 = vmatpush.bf16.msra.mxu0 %v1568_v61 }
 0x1b1   :  { %813 = vmatpush.bf16.msra.mxu1 %v1499_v39  ;;  %826 = vmatpush.bf16.msra.mxu2 %v1655_v30 }
 0x1b4   :  { %752 = vmatpush.bf16.msra.mxu0 %v1603_v12 }
 0x1b5   :  { %814 = vmatpush.bf16.msra.mxu1 %v1528_v49  ;;  %827 = vmatpush.bf16.msra.mxu2 %v1667_v35 }
 0x1b8   :  { %753 = vmatpush.bf16.msra.mxu0 %v1608_v14 }
 0x1b9   :  { %815 = vmatpush.bf16.msra.mxu1 %v1547_v54  ;;  %828 = vmatpush.bf16.msra.mxu2 %v1685_v40 }
 0x218   :  { %v553_v36 = vpop.f32.mrf.mxu0  ;;  %v566_v57 = vpop.f32.mrf.mxu1 }
 0x219   :  { %v583_v59 = vadd.f32 %v553_v36, %v1746_v48  ;;  %v603_v31 = vadd.f32 %v566_v57, %v159_v27 }
 0x21b   :  { %v1228_v2 = vmul.f32 -1.442695, %v583_v59  ;;  %v1229_v42 = vmul.f32 -1.442695, %v603_v31 }
 0x21d   :  { %1296 = vpow2.f32 %v1228_v2  ;;  %v188_v2 = vadd.f32 %v1804_v38, %v1767_v43 }
 0x21e   :  { %1298 = vpow2.f32 %v1229_v42 }
 0x21f   :  { %v579_v10 = vpop.f32.mrf.mxu2 }
 0x220   :  { %v555_v13 = vpop.f32.mrf.mxu0  ;;  %v568_v22 = vpop.f32.mrf.mxu1  ;;  %v623_v59 = vadd.f32 %v1764_v29, %v579_v10 }
 0x223   :  { %v1297_v24 = vpop.eup %1296 }
 0x224   :  { %v1299_v25 = vpop.eup %1298  ;;  %v587_v45 = vadd.f32 1.0, %v1297_v24 }
 0x225   :  { %v607_v62 = vadd.f32 1.0, %v1299_v25 }
 0x226   :  { %1300 = vrcp.f32 %v587_v45  ;;  %v599_v60 = vand.u32 2147483648, %v587_v45  ;;  %v597_v1 = vand.u32 2147483647, %v587_v45  ;;  %vm593_vm2 = vweird.f32 %v587_v45 }
 0x227   :  { %1302 = vrcp.f32 %v607_v62  ;;  %v581_v33 = vpop.f32.mrf.mxu2  ;;  %v619_v25 = vand.u32 2147483648, %v607_v62  ;;  %vm613_vm6 = vweird.f32 %v607_v62 }
 0x228   :  { %v600_v36 = vor.u32 1.1754944e-38, %v599_v60  ;;  %vm598_vm4 = vcmp.eq.f32.partialorder %v597_v1, 8.507059e+37 }
 0x22c   :  { %v1301_v37 = vpop.eup %1300 }
 0x22d   :  { %v1303_v18 = vpop.eup %1302  ;;  %v589_v0 = vmul.f32 %v1301_v37, %v587_v45  ;;  %vm594_vm1 = vweird.f32 %v1301_v37  ;;  %v617_v45 = vand.u32 2147483647, %v607_v62 }
 0x22e   :  { %v609_v48 = vmul.f32 %v1303_v18, %v607_v62  ;;  %vm595_vm3 = vmor %vm593_vm2, %vm594_vm1  ;;  %vm614_vm5 = vweird.f32 %v1303_v18 }
 0x22f   :  { %v590_v5 = vsub.f32 1.0, %v589_v0  ;;  %vm615_vm7 = vmor %vm613_vm6, %vm614_vm5  ;;  %vm618_vm8 = vcmp.eq.f32.partialorder %v617_v45, 8.507059e+37 }
 0x230   :  { %v610_v27 = vsub.f32 1.0, %v609_v48 }
 0x231   :  { %v591_v6 = vmul.f32 %v1301_v37, %v590_v5 }
 0x232   :  { %v611_v13 = vmul.f32 %v1303_v18, %v610_v27 }
 0x233   :  { %v592_v19 = vadd.f32 %v1301_v37, %v591_v6 }
 0x234   :  { %v612_v24 = vadd.f32 %v1303_v18, %v611_v13 }
 0x235   :  { %v596_v57 = vsel %vm595_vm3, %v1301_v37, %v592_v19  ;;  %v620_v37 = vor.u32 1.1754944e-38, %v619_v25 }
 0x236   :  { %v601_v31 = vsel %vm598_vm4, %v600_v36, %v596_v57  ;;  %v616_v33 = vsel %vm615_vm7, %v1303_v18, %v612_v24 }
 0x237   :  { %v624_v42 = vmul.f32 %v623_v59, %v601_v31  ;;  %v621_v5 = vsel %vm618_vm8, %v620_v37, %v616_v33 }
 0x239   :  { %v625_v22 = vadd.f32 %v624_v42, %v188_v2 }
 0x23b   :  { %1304 = vtanh.f32 %v625_v22 }
 0x241   :  { %v1305_v0 = vpop.eup %1304 }
 0x242   :  { %v627_v10 = vsub.f32 %v1831_v9, %v1305_v0  ;;  %v161_v9 = vadd.f32 %v1806_v41, %v1756_v8 }
 0x244   :  { %v628_v48 = vmul.f32 %v627_v10, %v621_v5 }
 0x246   :  { %v1870_v60 = vadd.f32 %v1305_v0, %v628_v48 }
 0x248   :  { %630 = vst [vmem:[%s1999_s5 + $0x10] sm:$0xff] %v1870_v60  ;;  %v631_v38 = vpack.c.bf16 %v1870_v60, %v1870_v60 }
 0x24a   :  { %640 = vmatmul.bf16.vlgmr.msrb.gmra.mxu3 %v631_v38  ;;  %653 = vmatmul.bf16.vlgmr.msrb.gmra.mxu0 %v631_v38 }
 0x24b   :  { %666 = vmatmul.bf16.vlgmr.msrb.gmra.mxu1 %v631_v38  ;;  %834 = vmatpush.bf16.msrb.mxu3 %v1434_v17 }
 0x24c   :  { %896 = vmatpush.bf16.msrb.mxu0 %v1406_v7  ;;  %909 = vmatpush.bf16.msrb.mxu1 %v1551_v55 }
 0x24f   :  { %835 = vmatpush.bf16.msrb.mxu3 %v1446_v21 }
 0x250   :  { %897 = vmatpush.bf16.msrb.mxu0 %v1415_v11  ;;  %910 = vmatpush.bf16.msrb.mxu1 %v1586_v3 }
 0x253   :  { %836 = vmatpush.bf16.msrb.mxu3 %v1469_v28 }
 0x254   :  { %898 = vmatpush.bf16.msrb.mxu0 %v1443_v20  ;;  %911 = vmatpush.bf16.msrb.mxu1 %v1611_v15 }
 0x257   :  { %837 = vmatpush.bf16.msrb.mxu3 %v1487_v34 }
 0x258   :  { %899 = vmatpush.bf16.msrb.mxu0 %v1463_v26  ;;  %912 = vmatpush.bf16.msrb.mxu1 %v1628_v23 }
 0x25b   :  { %838 = vmatpush.bf16.msrb.mxu3 %v1522_v46 }
 0x25c   :  { %900 = vmatpush.bf16.msrb.mxu0 %v1481_v32  ;;  %913 = vmatpush.bf16.msrb.mxu1 %v1643_v16 }
 0x25f   :  { %839 = vmatpush.bf16.msrb.mxu3 %v1568_v61 }
 0x260   :  { %901 = vmatpush.bf16.msrb.mxu0 %v1499_v39  ;;  %914 = vmatpush.bf16.msrb.mxu1 %v1655_v30 }
 0x263   :  { %840 = vmatpush.bf16.msrb.mxu3 %v1603_v12 }
 0x264   :  { %902 = vmatpush.bf16.msrb.mxu0 %v1528_v49  ;;  %915 = vmatpush.bf16.msrb.mxu1 %v1667_v35 }
 0x267   :  { %841 = vmatpush.bf16.msrb.mxu3 %v1608_v14 }
 0x268   :  { %903 = vmatpush.bf16.msrb.mxu0 %v1547_v54  ;;  %916 = vmatpush.bf16.msrb.mxu1 %v1685_v40 }
 0x2c7   :  { %v654_v62 = vpop.f32.mrf.mxu0 }
 0x2c8   :  { %v691_v18 = vadd.f32 %v654_v62, %v161_v9  ;;  %v667_v6 = vpop.f32.mrf.mxu1 }
 0x2c9   :  { %v711_v38 = vadd.f32 %v1764_v29, %v667_v6 }
 0x2ca   :  { %v1231_v1 = vmul.f32 -1.442695, %v691_v18  ;;  %v190_v18 = vadd.f32 %v1808_v44, %v1767_v43 }
 0x2cc   :  { %1306 = vpow2.f32 %v1231_v1 }
 0x2cd   :  { %v641_v19 = vpop.f32.mrf.mxu3 }
 0x2ce   :  { %v671_v27 = vadd.f32 %v641_v19, %v1748_v51 }
 0x2cf   :  { %v656_v36 = vpop.f32.mrf.mxu0 }
 0x2d0   :  { %v1230_v57 = vmul.f32 -1.442695, %v671_v27  ;;  %v669_v59 = vpop.f32.mrf.mxu1 }
 0x2d2   :  { %1308 = vpow2.f32 %v1230_v57  ;;  %v1307_v31 = vpop.eup %1306 }
 0x2d3   :  { %v695_v13 = vadd.f32 1.0, %v1307_v31 }
 0x2d5   :  { %v643_v2 = vpop.f32.mrf.mxu3  ;;  %v707_v57 = vand.u32 2147483648, %v695_v13  ;;  %vm701_vm14 = vweird.f32 %v695_v13  ;;  %v705_v59 = vand.u32 2147483647, %v695_v13 }
 0x2d7   :  { %vm706_vm0 = vcmp.eq.f32.partialorder %v705_v59, 8.507059e+37 }
 0x2d8   :  { %v1309_v42 = vpop.eup %1308 }
 0x2d9   :  { %v675_v22 = vadd.f32 1.0, %v1309_v42  ;;  %v708_v42 = vor.u32 1.1754944e-38, %v707_v57 }
 0x2db   :  { %1310 = vrcp.f32 %v675_v22  ;;  %v687_v0 = vand.u32 2147483648, %v675_v22  ;;  %v685_v51 = vand.u32 2147483647, %v675_v22  ;;  %vm681_vm10 = vweird.f32 %v675_v22 }
 0x2dc   :  { %1312 = vrcp.f32 %v695_v13 }
 0x2dd   :  { %v688_v48 = vor.u32 1.1754944e-38, %v687_v0  ;;  %vm686_vm12 = vcmp.eq.f32.partialorder %v685_v51, 8.507059e+37 }
 0x2e1   :  { %v1311_v41 = vpop.eup %1310 }
 0x2e2   :  { %v1313_v24 = vpop.eup %1312  ;;  %v677_v25 = vmul.f32 %v1311_v41, %v675_v22  ;;  %vm682_vm9 = vweird.f32 %v1311_v41 }
 0x2e3   :  { %v697_v33 = vmul.f32 %v1313_v24, %v695_v13  ;;  %vm683_vm11 = vmor %vm681_vm10, %vm682_vm9  ;;  %vm702_vm13 = vweird.f32 %v1313_v24 }
 0x2e4   :  { %v678_v45 = vsub.f32 1.0, %v677_v25  ;;  %vm703_vm15 = vmor %vm701_vm14, %vm702_vm13 }
 0x2e5   :  { %v698_v5 = vsub.f32 1.0, %v697_v33 }
 0x2e6   :  { %v679_v37 = vmul.f32 %v1311_v41, %v678_v45 }
 0x2e7   :  { %v699_v19 = vmul.f32 %v1313_v24, %v698_v5 }
 0x2e8   :  { %v680_v10 = vadd.f32 %v1311_v41, %v679_v37 }
 0x2e9   :  { %v700_v36 = vadd.f32 %v1313_v24, %v699_v19 }
 0x2ea   :  { %v684_v9 = vsel %vm683_vm11, %v1311_v41, %v680_v10 }
 0x2eb   :  { %v689_v62 = vsel %vm686_vm12, %v688_v48, %v684_v9  ;;  %v704_v31 = vsel %vm703_vm15, %v1313_v24, %v700_v36 }
 0x2ec   :  { %v712_v1 = vmul.f32 %v711_v38, %v689_v62  ;;  %v709_v22 = vsel %vm706_vm0, %v708_v42, %v704_v31  ;;  %v193_v38 = vadd.f32 %v1812_v50, %v1767_v43 }
 0x2ee   :  { %v713_v27 = vadd.f32 %v712_v1, %v190_v18 }
 0x2f0   :  { %1314 = vtanh.f32 %v713_v27 }
 0x2f6   :  { %v1315_v2 = vpop.eup %1314 }
 0x2f7   :  { %v715_v6 = vsub.f32 %v1870_v60, %v1315_v2 }
 0x2f9   :  { %v716_v41 = vmul.f32 %v715_v6, %v709_v22 }
 0x2fb   :  { %v1909_v25 = vadd.f32 %v1315_v2, %v716_v41 }
 0x2fd   :  { %718 = vst [vmem:[%s1999_s5 + $0x18] sm:$0xff] %v1909_v25  ;;  %v719_v44 = vpack.c.bf16 %v1909_v25, %v1909_v25 }
 0x2ff   :  { %728 = vmatmul.bf16.vlgmr.msrb.gmra.mxu2 %v719_v44  ;;  %741 = vmatmul.bf16.vlgmr.msra.gmra.mxu3 %v719_v44 }
 0x300   :  { %754 = vmatmul.bf16.vlgmr.msra.gmra.mxu0 %v719_v44  ;;  %922 = vmatpush.bf16.msrb.mxu2 %v1434_v17 }
 0x301   :  { %984 = vmatpush.bf16.msra.mxu3 %v1406_v7  ;;  %997 = vmatpush.bf16.msra.mxu0 %v1551_v55 }
 0x304   :  { %923 = vmatpush.bf16.msrb.mxu2 %v1446_v21 }
 0x305   :  { %985 = vmatpush.bf16.msra.mxu3 %v1415_v11  ;;  %998 = vmatpush.bf16.msra.mxu0 %v1586_v3  ;;  %v164_v11 = vadd.f32 %v1810_v47, %v1756_v8 }
 0x308   :  { %924 = vmatpush.bf16.msrb.mxu2 %v1469_v28 }
 0x309   :  { %986 = vmatpush.bf16.msra.mxu3 %v1443_v20  ;;  %999 = vmatpush.bf16.msra.mxu0 %v1611_v15 }
 0x30c   :  { %925 = vmatpush.bf16.msrb.mxu2 %v1487_v34 }
 0x30d   :  { %987 = vmatpush.bf16.msra.mxu3 %v1463_v26  ;;  %1000 = vmatpush.bf16.msra.mxu0 %v1628_v23 }
 0x310   :  { %926 = vmatpush.bf16.msrb.mxu2 %v1522_v46 }
 0x311   :  { %988 = vmatpush.bf16.msra.mxu3 %v1481_v32  ;;  %1001 = vmatpush.bf16.msra.mxu0 %v1643_v16 }
 0x314   :  { %927 = vmatpush.bf16.msrb.mxu2 %v1568_v61 }
 0x315   :  { %989 = vmatpush.bf16.msra.mxu3 %v1499_v39  ;;  %1002 = vmatpush.bf16.msra.mxu0 %v1655_v30 }
 0x318   :  { %928 = vmatpush.bf16.msrb.mxu2 %v1603_v12 }
 0x319   :  { %990 = vmatpush.bf16.msra.mxu3 %v1528_v49  ;;  %1003 = vmatpush.bf16.msra.mxu0 %v1667_v35 }
 0x31c   :  { %929 = vmatpush.bf16.msrb.mxu2 %v1608_v14 }
 0x31d   :  { %991 = vmatpush.bf16.msra.mxu3 %v1547_v54  ;;  %1004 = vmatpush.bf16.msra.mxu0 %v1685_v40 }
 0x37d   :  { %v755_v7 = vpop.f32.mrf.mxu0 }
 0x37e   :  { %v799_v10 = vadd.f32 %v1764_v29, %v755_v7 }
 0x382   :  { %v729_v20 = vpop.f32.mrf.mxu2  ;;  %v742_v26 = vpop.f32.mrf.mxu3 }
 0x383   :  { %v759_v32 = vadd.f32 %v729_v20, %v1750_v58  ;;  %v779_v39 = vadd.f32 %v742_v26, %v164_v11 }
 0x385   :  { %v1232_v55 = vmul.f32 -1.442695, %v759_v32  ;;  %v1233_v3 = vmul.f32 -1.442695, %v779_v39  ;;  %v757_v49 = vpop.f32.mrf.mxu0 }
 0x387   :  { %1316 = vpow2.f32 %v1232_v55 }
 0x388   :  { %1318 = vpow2.f32 %v1233_v3 }
 0x38a   :  { %v731_v15 = vpop.f32.mrf.mxu2  ;;  %v744_v23 = vpop.f32.mrf.mxu3 }
 0x38d   :  { %v1317_v16 = vpop.eup %1316 }
 0x38e   :  { %v1319_v54 = vpop.eup %1318  ;;  %v763_v30 = vadd.f32 1.0, %v1317_v16 }
 0x38f   :  { %v783_v35 = vadd.f32 1.0, %v1319_v54 }
 0x390   :  { %1320 = vrcp.f32 %v763_v30  ;;  %v775_v24 = vand.u32 2147483648, %v763_v30  ;;  %v773_v33 = vand.u32 2147483647, %v763_v30  ;;  %vm769_vm2 = vweird.f32 %v763_v30 }
 0x391   :  { %1322 = vrcp.f32 %v783_v35  ;;  %v795_v19 = vand.u32 2147483648, %v783_v35  ;;  %vm789_vm6 = vweird.f32 %v783_v35  ;;  %v793_v27 = vand.u32 2147483647, %v783_v35 }
 0x392   :  { %v776_v37 = vor.u32 1.1754944e-38, %v775_v24  ;;  %vm774_vm4 = vcmp.eq.f32.partialorder %v773_v33, 8.507059e+37 }
 0x393   :  { %v796_v59 = vor.u32 1.1754944e-38, %v795_v19  ;;  %vm794_vm8 = vcmp.eq.f32.partialorder %v793_v27, 8.507059e+37 }
 0x396   :  { %v1321_v40 = vpop.eup %1320 }
 0x397   :  { %v1323_v47 = vpop.eup %1322  ;;  %v765_v60 = vmul.f32 %v1321_v40, %v763_v30  ;;  %vm770_vm1 = vweird.f32 %v1321_v40 }
 0x398   :  { %v785_v58 = vmul.f32 %v1323_v47, %v783_v35  ;;  %vm771_vm3 = vmor %vm769_vm2, %vm770_vm1  ;;  %vm790_vm5 = vweird.f32 %v1323_v47 }
 0x399   :  { %v766_v13 = vsub.f32 1.0, %v765_v60  ;;  %vm791_vm7 = vmor %vm789_vm6, %vm790_vm5 }
 0x39a   :  { %v786_v51 = vsub.f32 1.0, %v785_v58 }
 0x39b   :  { %v767_v45 = vmul.f32 %v1321_v40, %v766_v13 }
 0x39c   :  { %v787_v62 = vmul.f32 %v1323_v47, %v786_v51 }
 0x39d   :  { %v768_v0 = vadd.f32 %v1321_v40, %v767_v45 }
 0x39e   :  { %v788_v1 = vadd.f32 %v1323_v47, %v787_v62 }
 0x39f   :  { %v772_v5 = vsel %vm771_vm3, %v1321_v40, %v768_v0  ;;  %v195_v40 = vadd.f32 %v1816_v53, %v1767_v43 }
 0x3a0   :  { %v777_v48 = vsel %vm774_vm4, %v776_v37, %v772_v5  ;;  %v792_v36 = vsel %vm791_vm7, %v1323_v47, %v788_v1 }
 0x3a1   :  { %v800_v9 = vmul.f32 %v799_v10, %v777_v48  ;;  %v797_v2 = vsel %vm794_vm8, %v796_v59, %v792_v36 }
 0x3a3   :  { %v801_v18 = vadd.f32 %v800_v9, %v193_v38  ;;  %v169_v38 = vadd.f32 %v1818_v56, %v1756_v8 }
 0x3a5   :  { %1324 = vtanh.f32 %v801_v18 }
 0x3ab   :  { %v1325_v57 = vpop.eup %1324 }
 0x3ac   :  { %v803_v31 = vsub.f32 %v1909_v25, %v1325_v57 }
 0x3ae   :  { %v804_v42 = vmul.f32 %v803_v31, %v797_v2 }
 0x3b0   :  { %v1948_v6 = vadd.f32 %v1325_v57, %v804_v42 }
 0x3b2   :  { %806 = vst [vmem:[%s1999_s5 + $0x20] sm:$0xff] %v1948_v6  ;;  %v807_v50 = vpack.c.bf16 %v1948_v6, %v1948_v6 }
 0x3b4   :  { %816 = vmatmul.bf16.vlgmr.msra.gmra.mxu1 %v807_v50  ;;  %829 = vmatmul.bf16.vlgmr.msra.gmra.mxu2 %v807_v50 }
 0x3b5   :  { %842 = vmatmul.bf16.vlgmr.msrb.gmra.mxu3 %v807_v50  ;;  %1010 = vmatpush.bf16.msra.mxu1 %v1434_v17  ;;  %v166_v17 = vadd.f32 %v1814_v52, %v1756_v8 }
 0x3b9   :  { %1011 = vmatpush.bf16.msra.mxu1 %v1446_v21 }
 0x3bd   :  { %1012 = vmatpush.bf16.msra.mxu1 %v1469_v28 }
 0x3c1   :  { %1013 = vmatpush.bf16.msra.mxu1 %v1487_v34 }
 0x3c5   :  { %1014 = vmatpush.bf16.msra.mxu1 %v1522_v46 }
 0x3c9   :  { %1015 = vmatpush.bf16.msra.mxu1 %v1568_v61 }
 0x3cd   :  { %1016 = vmatpush.bf16.msra.mxu1 %v1603_v12 }
 0x3d1   :  { %1017 = vmatpush.bf16.msra.mxu1 %v1608_v14 }
 0x431   :  { %v817_v22 = vpop.f32.mrf.mxu1 }
 0x432   :  { %v847_v41 = vadd.f32 %v817_v22, %v1752_v63 }
 0x434   :  { %v1234_v25 = vmul.f32 -1.442695, %v847_v41 }
 0x436   :  { %1326 = vpow2.f32 %v1234_v25 }
 0x437   :  { %v830_v21 = vpop.f32.mrf.mxu2 }
 0x438   :  { %v867_v28 = vadd.f32 %v830_v21, %v166_v17  ;;  %v843_v44 = vpop.f32.mrf.mxu3 }
 0x439   :  { %v819_v34 = vpop.f32.mrf.mxu1  ;;  %v887_v30 = vadd.f32 %v1764_v29, %v843_v44 }
 0x43a   :  { %v1235_v7 = vmul.f32 -1.442695, %v867_v28 }
 0x43c   :  { %v1327_v46 = vpop.eup %1326  ;;  %1328 = vpow2.f32 %v1235_v7 }
 0x43d   :  { %v851_v61 = vadd.f32 1.0, %v1327_v46 }
 0x43f   :  { %1330 = vrcp.f32 %v851_v61  ;;  %v832_v12 = vpop.f32.mrf.mxu2  ;;  %v863_v39 = vand.u32 2147483648, %v851_v61  ;;  %v861_v55 = vand.u32 2147483647, %v851_v61  ;;  %vm857_vm10 = vweird.f32 %v851_v61 }
 0x440   :  { %v845_v11 = vpop.f32.mrf.mxu3 }
 0x441   :  { %v864_v23 = vor.u32 1.1754944e-38, %v863_v39  ;;  %vm862_vm12 = vcmp.eq.f32.partialorder %v861_v55, 8.507059e+37  ;;  %v2004_v11 = vld [vmem:[#allocation4_spill] sm:$0xff] }
 0x442   :  { %v1329_v14 = vpop.eup %1328 }
 0x443   :  { %v871_v20 = vadd.f32 1.0, %v1329_v14  ;;  %v198_v14 = vadd.f32 %v2004_v11, %v1767_v43 }
 0x445   :  { %v1331_v26 = vpop.eup %1330  ;;  %1332 = vrcp.f32 %v871_v20  ;;  %v883_v58 = vand.u32 2147483648, %v871_v20  ;;  %vm877_vm14 = vweird.f32 %v871_v20  ;;  %v881_v45 = vand.u32 2147483647, %v871_v20 }
 0x446   :  { %v853_v63 = vmul.f32 %v1331_v26, %v851_v61  ;;  %vm858_vm9 = vweird.f32 %v1331_v26 }
 0x447   :  { %vm859_vm11 = vmor %vm857_vm10, %vm858_vm9  ;;  %v884_v37 = vor.u32 1.1754944e-38, %v883_v58  ;;  %vm882_vm0 = vcmp.eq.f32.partialorder %v881_v45, 8.507059e+37  ;;  %v2006_v58 = vld [vmem:[#allocation3_spill] sm:$0xff] }
 0x448   :  { %v854_v32 = vsub.f32 1.0, %v853_v63 }
 0x44a   :  { %v855_v52 = vmul.f32 %v1331_v26, %v854_v32 }
 0x44b   :  { %v1333_v3 = vpop.eup %1332 }
 0x44c   :  { %v873_v49 = vmul.f32 %v1333_v3, %v871_v20  ;;  %v856_v15 = vadd.f32 %v1331_v26, %v855_v52  ;;  %vm878_vm13 = vweird.f32 %v1333_v3 }
 0x44d   :  { %vm879_vm15 = vmor %vm877_vm14, %vm878_vm13 }
 0x44e   :  { %v874_v16 = vsub.f32 1.0, %v873_v49  ;;  %v860_v54 = vsel %vm859_vm11, %v1331_v26, %v856_v15 }
 0x44f   :  { %v865_v35 = vsel %vm862_vm12, %v864_v23, %v860_v54 }
 0x450   :  { %v888_v47 = vmul.f32 %v887_v30, %v865_v35  ;;  %v875_v60 = vmul.f32 %v1333_v3, %v874_v16  ;;  %v2005_v30 = vld [vmem:[#allocation5_spill] sm:$0xff] }
 0x451   :  { %v171_v35 = vadd.f32 %v2005_v30, %v1756_v8 }
 0x452   :  { %v889_v13 = vadd.f32 %v888_v47, %v195_v40  ;;  %v876_v24 = vadd.f32 %v1333_v3, %v875_v60 }
 0x454   :  { %1334 = vtanh.f32 %v889_v13  ;;  %v880_v33 = vsel %vm879_vm15, %v1333_v3, %v876_v24 }
 0x455   :  { %v885_v10 = vsel %vm882_vm0, %v884_v37, %v880_v33 }
 0x45a   :  { %v1335_v0 = vpop.eup %1334 }
 0x45b   :  { %v891_v51 = vsub.f32 %v1948_v6, %v1335_v0 }
 0x45d   :  { %v892_v5 = vmul.f32 %v891_v51, %v885_v10 }
 0x45f   :  { %v893_v48 = vadd.f32 %v1335_v0, %v892_v5 }
 0x461   :  { %894 = vst [vmem:[%s1999_s5 + $0x28] sm:$0xff] %v893_v48  ;;  %v895_v53 = vpack.c.bf16 %v893_v48, %v893_v48 }
 0x463   :  { %904 = vmatmul.bf16.vlgmr.msrb.gmra.mxu0 %v895_v53  ;;  %917 = vmatmul.bf16.vlgmr.msrb.gmra.mxu1 %v895_v53 }
 0x464   :  { %930 = vmatmul.bf16.vlgmr.msrb.gmra.mxu2 %v895_v53 }
 0x4e0   :  { %v905_v9 = vpop.f32.mrf.mxu0  ;;  %v918_v62 = vpop.f32.mrf.mxu1 }
 0x4e1   :  { %v935_v18 = vadd.f32 %v905_v9, %v1754_v4  ;;  %v955_v1 = vadd.f32 %v918_v62, %v169_v38 }
 0x4e3   :  { %v1236_v19 = vmul.f32 -1.442695, %v935_v18  ;;  %v1237_v27 = vmul.f32 -1.442695, %v955_v1 }
 0x4e5   :  { %1336 = vpow2.f32 %v1236_v19 }
 0x4e6   :  { %1338 = vpow2.f32 %v1237_v27 }
 0x4e7   :  { %v931_v36 = vpop.f32.mrf.mxu2 }
 0x4e8   :  { %v907_v57 = vpop.f32.mrf.mxu0  ;;  %v920_v59 = vpop.f32.mrf.mxu1  ;;  %v975_v61 = vadd.f32 %v1764_v29, %v931_v36 }
 0x4eb   :  { %v1337_v31 = vpop.eup %1336 }
 0x4ec   :  { %v1339_v2 = vpop.eup %1338  ;;  %v939_v42 = vadd.f32 1.0, %v1337_v31  ;;  %v1356_v31 = vld [vmem:[%s1997_s4] ss:$0 sm:$0xff] }
 0x4ed   :  { %v959_v6 = vadd.f32 1.0, %v1339_v2 }
 0x4ee   :  { %1340 = vrcp.f32 %v939_v42  ;;  %v951_v17 = vand.u32 2147483648, %v939_v42  ;;  %v949_v28 = vand.u32 2147483647, %v939_v42  ;;  %vm945_vm2 = vweird.f32 %v939_v42 }
 0x4ef   :  { %1342 = vrcp.f32 %v959_v6  ;;  %v933_v50 = vpop.f32.mrf.mxu2  ;;  %v971_v39 = vand.u32 2147483648, %v959_v6  ;;  %vm965_vm6 = vweird.f32 %v959_v6  ;;  %v969_v52 = vand.u32 2147483647, %v959_v6 }
 0x4f0   :  { %v952_v7 = vor.u32 1.1754944e-38, %v951_v17  ;;  %vm950_vm4 = vcmp.eq.f32.partialorder %v949_v28, 8.507059e+37  ;;  %v2007_v50 = vld [vmem:[#allocation6_spill] sm:$0xff] }
 0x4f1   :  { %v972_v49 = vor.u32 1.1754944e-38, %v971_v39  ;;  %vm970_vm8 = vcmp.eq.f32.partialorder %v969_v52, 8.507059e+37 }
 0x4f4   :  { %v1341_v56 = vpop.eup %1340 }
 0x4f5   :  { %v1343_v22 = vpop.eup %1342  ;;  %v941_v41 = vmul.f32 %v1341_v56, %v939_v42  ;;  %vm946_vm1 = vweird.f32 %v1341_v56 }
 0x4f6   :  { %v961_v4 = vmul.f32 %v1343_v22, %v959_v6  ;;  %vm947_vm3 = vmor %vm945_vm2, %vm946_vm1  ;;  %vm966_vm5 = vweird.f32 %v1343_v22 }
 0x4f7   :  { %v942_v25 = vsub.f32 1.0, %v941_v41  ;;  %vm967_vm7 = vmor %vm965_vm6, %vm966_vm5 }
 0x4f8   :  { %v962_v34 = vsub.f32 1.0, %v961_v4 }
 0x4f9   :  { %v943_v21 = vmul.f32 %v1341_v56, %v942_v25 }
 0x4fa   :  { %v963_v26 = vmul.f32 %v1343_v22, %v962_v34 }
 0x4fb   :  { %v944_v44 = vadd.f32 %v1341_v56, %v943_v21 }
 0x4fc   :  { %v964_v32 = vadd.f32 %v1343_v22, %v963_v26 }
 0x4fd   :  { %v948_v46 = vsel %vm947_vm3, %v1341_v56, %v944_v44  ;;  %v200_v56 = vadd.f32 %v2007_v50, %v1767_v43 }
 0x4fe   :  { %v953_v12 = vsel %vm950_vm4, %v952_v7, %v948_v46  ;;  %v968_v55 = vsel %vm967_vm7, %v1343_v22, %v964_v32 }
 0x4ff   :  { %v976_v20 = vmul.f32 %v975_v61, %v953_v12  ;;  %v973_v29 = vsel %vm970_vm8, %v972_v49, %v968_v55 }
 0x501   :  { %v977_v63 = vadd.f32 %v976_v20, %v198_v14 }
 0x503   :  { %1344 = vtanh.f32 %v977_v63 }
 0x509   :  { %v1345_v3 = vpop.eup %1344 }
 0x50a   :  { %v979_v15 = vsub.f32 %v893_v48, %v1345_v3 }
 0x50c   :  { %v980_v23 = vmul.f32 %v979_v15, %v973_v29 }
 0x50e   :  { %v981_v16 = vadd.f32 %v1345_v3, %v980_v23 }
 0x510   :  { %982 = vst [vmem:[%s1999_s5 + $0x30] sm:$0xff] %v981_v16  ;;  %v983_v54 = vpack.c.bf16 %v981_v16, %v981_v16 }
 0x512   :  { %992 = vmatmul.bf16.vlgmr.msra.gmra.mxu3 %v983_v54  ;;  %1005 = vmatmul.bf16.vlgmr.msra.gmra.mxu0 %v983_v54 }
 0x513   :  { %1018 = vmatmul.bf16.vlgmr.msra.gmra.mxu1 %v983_v54 }
 0x58f   :  { %v1006_v40 = vpop.f32.mrf.mxu0 }
 0x590   :  { %v1043_v47 = vadd.f32 %v1006_v40, %v171_v35  ;;  %v1019_v60 = vpop.f32.mrf.mxu1 }
 0x591   :  { %v1063_v2 = vadd.f32 %v1356_v31, %v1019_v60 }
 0x592   :  { %v1239_v13 = vmul.f32 -1.442695, %v1043_v47 }
 0x594   :  { %1346 = vpow2.f32 %v1239_v13 }
 0x595   :  { %v993_v24 = vpop.f32.mrf.mxu3 }
 0x596   :  { %v1023_v45 = vadd.f32 %v993_v24, %v2006_v58 }
 0x597   :  { %v1008_v33 = vpop.f32.mrf.mxu0 }
 0x598   :  { %v1238_v0 = vmul.f32 -1.442695, %v1023_v45  ;;  %v1021_v37 = vpop.f32.mrf.mxu1 }
 0x59a   :  { %1348 = vpow2.f32 %v1238_v0  ;;  %v1347_v51 = vpop.eup %1346 }
 0x59b   :  { %v1047_v48 = vadd.f32 1.0, %v1347_v51 }
 0x59d   :  { %v995_v10 = vpop.f32.mrf.mxu3  ;;  %v1059_v17 = vand.u32 2147483648, %v1047_v48  ;;  %vm1053_vm14 = vweird.f32 %v1047_v48  ;;  %v1057_v21 = vand.u32 2147483647, %v1047_v48 }
 0x59f   :  { %v1060_v34 = vor.u32 1.1754944e-38, %v1059_v17  ;;  %vm1058_vm0 = vcmp.eq.f32.partialorder %v1057_v21, 8.507059e+37 }
 0x5a0   :  { %v1349_v5 = vpop.eup %1348 }
 0x5a1   :  { %v1027_v53 = vadd.f32 1.0, %v1349_v5 }
 0x5a3   :  { %1350 = vrcp.f32 %v1027_v53  ;;  %v1039_v1 = vand.u32 2147483648, %v1027_v53  ;;  %v1037_v27 = vand.u32 2147483647, %v1027_v53  ;;  %vm1033_vm10 = vweird.f32 %v1027_v53 }
 0x5a4   :  { %1352 = vrcp.f32 %v1047_v48 }
 0x5a5   :  { %v1040_v59 = vor.u32 1.1754944e-38, %v1039_v1  ;;  %vm1038_vm12 = vcmp.eq.f32.partialorder %v1037_v27, 8.507059e+37 }
 0x5a9   :  { %v1351_v8 = vpop.eup %1350 }
 0x5aa   :  { %v1353_v38 = vpop.eup %1352  ;;  %v1029_v9 = vmul.f32 %v1351_v8, %v1027_v53  ;;  %vm1034_vm9 = vweird.f32 %v1351_v8 }
 0x5ab   :  { %v1049_v18 = vmul.f32 %v1353_v38, %v1047_v48  ;;  %vm1035_vm11 = vmor %vm1033_vm10, %vm1034_vm9  ;;  %vm1054_vm13 = vweird.f32 %v1353_v38 }
 0x5ac   :  { %v1030_v62 = vsub.f32 1.0, %v1029_v9  ;;  %vm1055_vm15 = vmor %vm1053_vm14, %vm1054_vm13 }
 0x5ad   :  { %v1050_v57 = vsub.f32 1.0, %v1049_v18 }
 0x5ae   :  { %v1031_v19 = vmul.f32 %v1351_v8, %v1030_v62 }
 0x5af   :  { %v1051_v41 = vmul.f32 %v1353_v38, %v1050_v57 }
 0x5b0   :  { %v1032_v36 = vadd.f32 %v1351_v8, %v1031_v19 }
 0x5b1   :  { %v1052_v4 = vadd.f32 %v1353_v38, %v1051_v41 }
 0x5b2   :  { %v1036_v42 = vsel %vm1035_vm11, %v1351_v8, %v1032_v36 }
 0x5b3   :  { %v1041_v6 = vsel %vm1038_vm12, %v1040_v59, %v1036_v42  ;;  %v1056_v28 = vsel %vm1055_vm15, %v1353_v38, %v1052_v4 }
 0x5b4   :  { %v1064_v22 = vmul.f32 %v1063_v2, %v1041_v6  ;;  %v1061_v46 = vsel %vm1058_vm0, %v1060_v34, %v1056_v28 }
 0x5b6   :  { %v1065_v25 = vadd.f32 %v1064_v22, %v200_v56 }
 0x5b8   :  { %1354 = vtanh.f32 %v1065_v25 }
 0x5be   :  { %v1355_v44 = vpop.eup %1354 }
 0x5bf   :  { %v1067_v7 = vsub.f32 %v981_v16, %v1355_v44 }
 0x5c1   :  { %v1068_v61 = vmul.f32 %v1067_v7, %v1061_v46 }
 0x5c3   :  { %v1069_v12 = vadd.f32 %v1355_v44, %v1068_v61 }
 0x5c5   :  { %1070 = vst [vmem:[%s1999_s5 + $0x38] sm:$0xff] %v1069_v12 }

</bundles_post_ra>
